<compile_context>
chip_gen: v5e
topology: v5e:2x2
jax: 0.10.0
libtpu: 0.0.40
codegen_flags: <defaults>
</compile_context>

<pallas_src>
import functools
import math

import jax
import jax.numpy as jnp
import numpy as np
from jax.experimental import pallas as pl
from jax.experimental.pallas import tpu as pltpu


# -----------------------------------------------------------------------------
# helpers
# -----------------------------------------------------------------------------
def _round_up(n, m):
    return (n + m - 1) // m * m


def _pad_rows(x2d, tm):
    """Pad the row dim of [N, D] up to a multiple of tm with zeros."""
    n = x2d.shape[0]
    pad = _round_up(n, tm) - n
    if pad:
        x2d = jnp.concatenate(
            [x2d, jnp.zeros((pad, x2d.shape[1]), x2d.dtype)], axis=0)
    return x2d


# -----------------------------------------------------------------------------
# LayerNorm kernel
# -----------------------------------------------------------------------------
def _layer_norm_kernel(x_ref, g_ref, b_ref, o_ref, *, eps):
    x = x_ref[...].astype(jnp.float32)
    mean = jnp.mean(x, axis=-1, keepdims=True)
    xc = x - mean
    var = jnp.mean(xc * xc, axis=-1, keepdims=True)
    y = xc * jax.lax.rsqrt(var + eps)
    y = y * g_ref[...].astype(jnp.float32) + b_ref[...].astype(jnp.float32)
    o_ref[...] = y.astype(o_ref.dtype)


def layer_norm(x, gamma, beta, *, eps=1e-5, tm=256):
    orig_shape = x.shape
    d = orig_shape[-1]
    x2d = x.reshape(-1, d)
    n = x2d.shape[0]
    xp = _pad_rows(x2d, tm)
    out = pl.pallas_call(
        functools.partial(_layer_norm_kernel, eps=eps),
        out_shape=jax.ShapeDtypeStruct(xp.shape, x.dtype),
        grid_spec=pltpu.PrefetchScalarGridSpec(
            num_scalar_prefetch=0,
            grid=(xp.shape[0] // tm,),
            in_specs=[
                pl.BlockSpec((tm, d), lambda i: (i, 0)),
                pl.BlockSpec((1, d), lambda i: (0, 0)),
                pl.BlockSpec((1, d), lambda i: (0, 0)),
            ],
            out_specs=pl.BlockSpec((tm, d), lambda i: (i, 0)),
        ),
        compiler_params=pltpu.CompilerParams(
            dimension_semantics=("parallel",)),
    )(xp, gamma.reshape(1, d), beta.reshape(1, d))
    return out[:n].reshape(orig_shape)


# -----------------------------------------------------------------------------
# Linear kernel (used for the fused Q/K/V projection and the attention fc)
# -----------------------------------------------------------------------------
def _linear_kernel(x_ref, w_ref, b_ref, o_ref):
    # Operands go to the MXU in their native dtype; accumulation is f32.
    acc = jnp.dot(x_ref[...], w_ref[...], preferred_element_type=jnp.float32)
    acc = acc + b_ref[...].astype(jnp.float32)
    o_ref[...] = acc.astype(o_ref.dtype)


def linear(x2d, w, b, *, tm=256):
    n, din = x2d.shape
    dout = w.shape[1]
    xp = _pad_rows(x2d, tm)
    out = pl.pallas_call(
        _linear_kernel,
        out_shape=jax.ShapeDtypeStruct((xp.shape[0], dout), x2d.dtype),
        grid_spec=pltpu.PrefetchScalarGridSpec(
            num_scalar_prefetch=0,
            grid=(xp.shape[0] // tm,),
            in_specs=[
                pl.BlockSpec((tm, din), lambda i: (i, 0)),
                pl.BlockSpec((din, dout), lambda i: (0, 0)),
                pl.BlockSpec((1, dout), lambda i: (0, 0)),
            ],
            out_specs=pl.BlockSpec((tm, dout), lambda i: (i, 0)),
        ),
        compiler_params=pltpu.CompilerParams(
            dimension_semantics=("parallel",)),
    )(xp, w, b.reshape(1, dout))
    return out[:n]


# -----------------------------------------------------------------------------
# Scaled dot-product attention kernel (per head*batch)
# -----------------------------------------------------------------------------
def _attention_kernel(q_ref, k_ref, v_ref, m_ref, o_ref, *, scale):
    q = q_ref[0]
    k = k_ref[0]
    v = v_ref[0]
    m = m_ref[0].astype(jnp.float32)
    # score = (q @ k^T) * scale; contract the dk axis of both operands.
    score = jax.lax.dot_general(
        q, k, (((1,), (1,)), ((), ())),
        preferred_element_type=jnp.float32) * scale
    score = score * (1.0 - m) + m * (-10000000.0)        # mask_logits(score, mask)
    score = score - jnp.max(score, axis=-1, keepdims=True)
    p = jnp.exp(score)
    p = p * pl.reciprocal(jnp.sum(p, axis=-1, keepdims=True), approx=True)
    p = p * (1.0 - m)                                    # mask_logits(weights, mask, 0)
    # TODO(synk): attention-weight dropout (inference identity here).
    out = jnp.dot(p.astype(v.dtype), v, preferred_element_type=jnp.float32)
    o_ref[0] = out.astype(o_ref.dtype)


def scaled_dot_attention(q, k, v, mask, *, scale):
    """q,k: [B, slen, dk], v: [B, slen, dv], mask: [B, slen, slen] -> [B, slen, dv]."""
    bh, slen, dk = q.shape
    dv = v.shape[-1]
    # TODO(synk): flash-style kv tiling for long sequences; here the full
    # [slen, slen] score tile stays resident in VMEM (small slen).
    return pl.pallas_call(
        functools.partial(_attention_kernel, scale=scale),
        out_shape=jax.ShapeDtypeStruct((bh, slen, dv), q.dtype),
        grid_spec=pltpu.PrefetchScalarGridSpec(
            num_scalar_prefetch=0,
            grid=(bh,),
            in_specs=[
                pl.BlockSpec((1, slen, dk), lambda i: (i, 0, 0)),
                pl.BlockSpec((1, slen, dk), lambda i: (i, 0, 0)),
                pl.BlockSpec((1, slen, dv), lambda i: (i, 0, 0)),
                pl.BlockSpec((1, slen, slen), lambda i: (i, 0, 0)),
            ],
            out_specs=pl.BlockSpec((1, slen, dv), lambda i: (i, 0, 0)),
        ),
        compiler_params=pltpu.CompilerParams(
            dimension_semantics=("parallel",)),
    )(q, k, v, mask)


# -----------------------------------------------------------------------------
# Depthwise-separable convolution kernel (depthwise taps + ReLU + pointwise)
# -----------------------------------------------------------------------------
def _dwsep_conv_kernel(xp_ref, wd_ref, bd_ref, wp_ref, bp_ref, o_ref):
    slen = o_ref.shape[1]
    ksize = wd_ref.shape[0]
    xpad = xp_ref[0]                                     # (slen + ksize - 1, C)
    wd = wd_ref[...].astype(jnp.float32)                 # (ksize, C)
    acc = jnp.zeros((slen, xpad.shape[-1]), jnp.float32)
    for t in range(ksize):                               # static unroll over taps
        acc = acc + xpad[t:t + slen, :].astype(jnp.float32) * wd[t:t + 1, :]
    acc = acc + bd_ref[...].astype(jnp.float32)
    acc = jnp.maximum(acc, 0.0)                          # ReLU between depthwise/pointwise
    out = jnp.dot(acc.astype(wp_ref.dtype), wp_ref[...],
                  preferred_element_type=jnp.float32)
    out = out + bp_ref[...].astype(jnp.float32)
    o_ref[0] = out.astype(o_ref.dtype)


def dwsep_conv(x, wd, bd, wp, bp):
    """x: [b, slen, C]; wd: [k, C]; bd: [C]; wp: [C, Cout]; bp: [Cout]."""
    b, slen, c = x.shape
    ksize = wd.shape[0]
    assert ksize % 2 == 1, "same-length output requires an odd kernel size"
    cout = wp.shape[1]
    pad = ksize // 2
    xpad = jnp.pad(x, ((0, 0), (pad, pad), (0, 0)))
    return pl.pallas_call(
        _dwsep_conv_kernel,
        out_shape=jax.ShapeDtypeStruct((b, slen, cout), x.dtype),
        grid_spec=pltpu.PrefetchScalarGridSpec(
            num_scalar_prefetch=0,
            grid=(b,),
            in_specs=[
                pl.BlockSpec((1, slen + 2 * pad, c), lambda i: (i, 0, 0)),
                pl.BlockSpec((ksize, c), lambda i: (0, 0)),
                pl.BlockSpec((1, c), lambda i: (0, 0)),
                pl.BlockSpec((c, cout), lambda i: (0, 0)),
                pl.BlockSpec((1, cout), lambda i: (0, 0)),
            ],
            out_specs=pl.BlockSpec((1, slen, cout), lambda i: (i, 0, 0)),
        ),
        compiler_params=pltpu.CompilerParams(
            dimension_semantics=("parallel",)),
    )(xpad, wd, bd.reshape(1, c), wp, bp.reshape(1, cout))


# -----------------------------------------------------------------------------
# Position-wise FFN kernel: relu(x @ W1 + b1) @ W2 + b2
# -----------------------------------------------------------------------------
def _ffn_kernel(x_ref, w1_ref, b1_ref, w2_ref, b2_ref, o_ref, acc_ref):
    kk = pl.program_id(1)

    @pl.when(kk == 0)
    def _():
        acc_ref[...] = jnp.zeros_like(acc_ref)

    # Operands stay in their native dtype (bf16 feeds the MXU directly);
    # accumulation is f32 via preferred_element_type.
    inner = jnp.dot(x_ref[...], w1_ref[...], preferred_element_type=jnp.float32)
    inner = inner + b1_ref[...].astype(jnp.float32)
    inner = jnp.maximum(inner, 0.0)
    # TODO(synk): training-mode dropout on `inner` via pltpu.prng_* (identity here).

    acc_ref[...] += jnp.dot(inner.astype(w2_ref.dtype), w2_ref[...],
                            preferred_element_type=jnp.float32)

    @pl.when(kk == pl.num_programs(1) - 1)
    def _():
        o_ref[...] = (acc_ref[...] + b2_ref[...].astype(jnp.float32)
                      ).astype(o_ref.dtype)


def positionwise_feed_forward(x, w1, b1, w2, b2, *, tm=256,
                              vmem_budget_bytes=36 * 1024 * 1024):
    """relu(x @ W1 + b1) @ W2 + b2 over the last dim of x ([b, *, dmodel])."""
    orig_shape = x.shape
    dmodel = orig_shape[-1]
    dinner = w1.shape[1]
    assert dmodel % 128 == 0 and dinner % 128 == 0, (
        "dmodel/dinner must be multiples of 128 (lane-dense MXU tiles)")
    assert tm % 128 == 0, "row tile must be a multiple of 128"

    x2d = x.reshape(-1, dmodel)
    n_rows = x2d.shape[0]
    xp = _pad_rows(x2d, tm)            # pad rows instead of asserting divisibility
    n_row_tiles = xp.shape[0] // tm    # keep >1 row tiles at real sizes (megacore)
    itemsize = jnp.dtype(x.dtype).itemsize

    # VMEM footprint model -> choose the dinner (K) tile.
    def footprint(tk, n_weight_bufs):
        wbytes = (dmodel * tk + tk * dmodel + tk + dmodel) * itemsize * n_weight_bufs
        xbytes = 2 * tm * dmodel * itemsize      # double-buffered input rows
        obytes = 2 * tm * dmodel * itemsize      # double-buffered output rows
        abytes = tm * dmodel * 4                 # f32 accumulator scratch
        ibytes = tm * tk * 4                     # relu intermediate
        return wbytes + xbytes + obytes + abytes + ibytes

    tk = dinner
    if footprint(dinner, 1) > vmem_budget_bytes:
        # Resident weights don't fit (e.g. v7x 64 MiB VMEM): K-tile dinner with
        # an accumulator; relu commutes with the column partition so it's exact.
        tk = 128
        for cand in range(dinner - 128, 0, -128):
            if dinner % cand == 0 and footprint(cand, 2) <= vmem_budget_bytes:
                tk = cand
                break
    n_k = dinner // tk

    vmem_limit = int(min(48 * 1024 * 1024,
                         max(16 * 1024 * 1024, 2 * footprint(tk, 2))))
    cost = pl.CostEstimate(
        flops=4 * xp.shape[0] * dmodel * dinner,          # two matmuls: 2*M*K*N each
        transcendentals=0,
        bytes_accessed=int(xp.size * itemsize + xp.shape[0] * dmodel * itemsize
                           + (w1.size + w2.size + b1.size + b2.size) * itemsize),
    )

    b1_2d = b1.reshape(1, dinner)
    b2_2d = b2.reshape(1, dmodel)
    grid = (n_row_tiles, n_k)          # reduction (dinner) axis last / innermost

    def run(single_buffer_weights):
        wkw = dict(pipeline_mode=pl.Buffered(1)) if single_buffer_weights else {}
        in_specs = [
            pl.BlockSpec((tm, dmodel), lambda i, k: (i, 0)),
            pl.BlockSpec((dmodel, tk), lambda i, k: (0, k), **wkw),
            pl.BlockSpec((1, tk), lambda i, k: (0, k), **wkw),
            pl.BlockSpec((tk, dmodel), lambda i, k: (k, 0), **wkw),
            pl.BlockSpec((1, dmodel), lambda i, k: (0, 0), **wkw),
        ]
        return pl.pallas_call(
            _ffn_kernel,
            out_shape=jax.ShapeDtypeStruct((xp.shape[0], dmodel), x.dtype),
            grid_spec=pltpu.PrefetchScalarGridSpec(
                num_scalar_prefetch=0,
                grid=grid,
                in_specs=in_specs,
                out_specs=pl.BlockSpec((tm, dmodel), lambda i, k: (i, 0)),
                scratch_shapes=[pltpu.VMEM((tm, dmodel), jnp.float32)],
            ),
            compiler_params=pltpu.CompilerParams(
                dimension_semantics=("parallel", "arbitrary"),
                vmem_limit_bytes=vmem_limit),
            cost_estimate=cost,
        )(xp, w1, b1_2d, w2, b2_2d)

    if n_k == 1:
        # Weights/biases are grid-invariant -> single-buffer them (halves the
        # resident weight VMEM). Fall back to default double-buffering if this
        # jax/Mosaic build rejects pl.Buffered on pallas_call BlockSpecs.
        try:
            out2d = run(True)
        except Exception:
            out2d = run(False)
    else:
        out2d = run(False)

    return out2d[:n_rows].reshape(orig_shape)


# -----------------------------------------------------------------------------
# Multi-head attention wrapper (torch head layout preserved)
# -----------------------------------------------------------------------------
def multi_head_attention(x, attn_mask, ap, nhead):
    b, slen, d = x.shape
    dk = ap["wq"].shape[1] // nhead
    dv = ap["wv"].shape[1] // nhead
    x2d = x.reshape(-1, d)

    # Fuse the Q/K/V projections into a single MXU pass.
    wqkv = jnp.concatenate([ap["wq"], ap["wk"], ap["wv"]], axis=1)
    bqkv = jnp.concatenate([ap["bq"], ap["bk"], ap["bv"]], axis=0)
    qkv = linear(x2d, wqkv, bqkv)
    q, k, v = jnp.split(qkv, [nhead * dk, 2 * nhead * dk], axis=1)

    def to_heads(t, dh):              # [b*slen, nhead*dh] -> [nhead*b, slen, dh]
        return (t.reshape(b, slen, nhead, dh)
                 .transpose(2, 0, 1, 3)
                 .reshape(nhead * b, slen, dh))

    qh, kh, vh = to_heads(q, dk), to_heads(k, dk), to_heads(v, dv)
    mh = jnp.tile(attn_mask, (nhead, 1, 1)).astype(x.dtype)

    ah = scaled_dot_attention(qh, kh, vh, mh, scale=1.0 / math.sqrt(dk))
    a = (ah.reshape(nhead, b, slen, dv)
           .transpose(1, 2, 0, 3)
           .reshape(b * slen, nhead * dv))
    return linear(a, ap["wo"], ap["bo"]).reshape(b, slen, d)


# -----------------------------------------------------------------------------
# Parameters / positional encoding / full forward
# -----------------------------------------------------------------------------
def _positional_encoding_table(n_position, embed_size):
    pos = np.arange(n_position, dtype=np.float64)[:, None]
    idx = np.arange(embed_size, dtype=np.float64)[None, :]
    mat = pos / np.power(10000.0, 2.0 * idx / embed_size)
    mat[:, 0::2] = np.sin(mat[:, 0::2])
    mat[:, 1::2] = np.cos(mat[:, 1::2])
    return jnp.asarray(mat, dtype=jnp.float32)


def init_encoder_blocks_params(key, encode_size, n_block=1, n_conv=1,
                               kernel_size=7, n_position=400, nhead=8,
                               dtype=jnp.float32):
    """Shapes mirror the PyTorch module; linear weights stored as [in, out]."""
    d = encode_size
    dk = dv = d                        # MultiHeadAttention default: dk = dv = dmodel
    dinner = 4 * d
    pos_table = _positional_encoding_table(n_position, d)

    def uniform(k, shape, fan_in):
        lim = 1.0 / math.sqrt(fan_in)
        return jax.random.uniform(k, shape, dtype, -lim, lim)

    blocks = []
    for _ in range(n_block):
        n_keys = 4 * n_conv + 12
        key, *ks = jax.random.split(key, n_keys + 1)
        ks = iter(ks)
        convs = []
        for _ in range(n_conv):
            convs.append(dict(
                wd=uniform(next(ks), (kernel_size, d), kernel_size),   # depthwise taps
                bd=uniform(next(ks), (d,), kernel_size),
                wp=uniform(next(ks), (d, d), d),                       # pointwise 1x1
                bp=uniform(next(ks), (d,), d),
            ))
        attn = dict(
            wq=uniform(next(ks), (d, nhead * dk), d),
            bq=uniform(next(ks), (nhead * dk,), d),
            wk=uniform(next(ks), (d, nhead * dk), d),
            bk=uniform(next(ks), (nhead * dk,), d),
            wv=uniform(next(ks), (d, nhead * dv), d),
            bv=uniform(next(ks), (nhead * dv,), d),
            wo=uniform(next(ks), (nhead * dv, d), nhead * dv),
            bo=uniform(next(ks), (d,), nhead * dv),
        )
        ffn = dict(
            w1=uniform(next(ks), (d, dinner), d),
            b1=uniform(next(ks), (dinner,), d),
            w2=uniform(next(ks), (dinner, d), dinner),
            b2=uniform(next(ks), (d,), dinner),
        )
        blocks.append(dict(
            pos_table=pos_table,
            convs=convs, attn=attn, ffn=ffn,
            ln_g=jnp.ones((d,), dtype),   # single SublayerConnection per block:
            ln_b=jnp.zeros((d,), dtype),  # one LayerNorm shared by all sublayers
            nhead=nhead,
        ))
    return dict(blocks=blocks)


def encoder_blocks_forward(params, inputs, inputs_mask=None):
    """inputs: [b, slen, encode_size]; inputs_mask: [b, slen] (pad=1) or None."""
    x = inputs
    b, slen, _ = x.shape
    if inputs_mask is not None:
        keep = (1.0 - inputs_mask).astype(x.dtype)                 # [b, slen]
        attn_mask = 1.0 - keep[:, :, None] * keep[:, None, :]      # get_matrix_mask
        inputs_keep = keep[:, :, None]
    else:
        attn_mask = jnp.zeros((b, slen, slen), x.dtype)            # no-mask == all keep
        inputs_keep = None

    for blk in params["blocks"]:
        x = x + blk["pos_table"][:slen][None].astype(x.dtype)      # positional encoding
        for cp in blk["convs"]:                                    # x = conv(LN(x)) + x
            h = layer_norm(x, blk["ln_g"], blk["ln_b"])
            x = dwsep_conv(h, cp["wd"], cp["bd"], cp["wp"], cp["bp"]) + x
        h = layer_norm(x, blk["ln_g"], blk["ln_b"])                # x = MHA(LN(x)) + x
        x = multi_head_attention(h, attn_mask, blk["attn"], blk["nhead"]) + x
        if inputs_keep is not None:
            x = x * inputs_keep
        h = layer_norm(x, blk["ln_g"], blk["ln_b"])                # x = FFN(LN(x)) + x
        f = blk["ffn"]
        x = positionwise_feed_forward(h, f["w1"], f["b1"], f["w2"], f["b2"]) + x
        if inputs_keep is not None:
            x = x * inputs_keep
    return x


# -----------------------------------------------------------------------------
# Pure-JAX reference (no Pallas) for correctness checking
# -----------------------------------------------------------------------------
def encoder_blocks_reference(params, inputs, inputs_mask=None):
    prec = jax.lax.Precision.HIGHEST
    x = inputs
    b, slen, _ = x.shape
    if inputs_mask is not None:
        keep = (1.0 - inputs_mask).astype(x.dtype)
        attn_mask = 1.0 - keep[:, :, None] * keep[:, None, :]
        inputs_keep = keep[:, :, None]
    else:
        attn_mask = None
        inputs_keep = None

    def ln(t, g, bb):
        mu = jnp.mean(t, axis=-1, keepdims=True)
        var = jnp.mean((t - mu) ** 2, axis=-1, keepdims=True)
        return (t - mu) * jax.lax.rsqrt(var + 1e-5) * g + bb

    for blk in params["blocks"]:
        nhead = blk["nhead"]
        x = x + blk["pos_table"][:slen][None]
        for cp in blk["convs"]:
            h = ln(x, blk["ln_g"], blk["ln_b"])
            pad = cp["wd"].shape[0] // 2
            hpad = jnp.pad(h, ((0, 0), (pad, pad), (0, 0)))
            acc = sum(hpad[:, t:t + slen, :] * cp["wd"][t][None, None, :]
                      for t in range(cp["wd"].shape[0])) + cp["bd"]
            acc = jnp.maximum(acc, 0.0)
            conv_out = jnp.einsum("bsc,co->bso", acc, cp["wp"],
                                  precision=prec) + cp["bp"]
            x = conv_out + x

        h = ln(x, blk["ln_g"], blk["ln_b"])
        ap = blk["attn"]
        dk = ap["wq"].shape[1] // nhead
        dv = ap["wv"].shape[1] // nhead
        q = (jnp.einsum("bsd,de->bse", h, ap["wq"], precision=prec)
             + ap["bq"]).reshape(b, slen, nhead, dk)
        k = (jnp.einsum("bsd,de->bse", h, ap["wk"], precision=prec)
             + ap["bk"]).reshape(b, slen, nhead, dk)
        v = (jnp.einsum("bsd,de->bse", h, ap["wv"], precision=prec)
             + ap["bv"]).reshape(b, slen, nhead, dv)
        score = jnp.einsum("bqhe,bkhe->bhqk", q, k, precision=prec) / math.sqrt(dk)
        if attn_mask is not None:
            m = attn_mask[:, None, :, :]
            score = score * (1.0 - m) + m * (-10000000.0)
        w = jax.nn.softmax(score, axis=-1)
        if attn_mask is not None:
            w = w * (1.0 - m)
        att = jnp.einsum("bhqk,bkhe->bqhe", w, v,
                         precision=prec).reshape(b, slen, nhead * dv)
        att = jnp.einsum("bse,ed->bsd", att, ap["wo"], precision=prec) + ap["bo"]
        x = att + x
        if inputs_keep is not None:
            x = x * inputs_keep

        h = ln(x, blk["ln_g"], blk["ln_b"])
        f = blk["ffn"]
        inner = jnp.maximum(
            jnp.einsum("bsd,di->bsi", h, f["w1"], precision=prec) + f["b1"], 0.0)
        out = jnp.einsum("bsi,id->bsd", inner, f["w2"], precision=prec) + f["b2"]
        x = out + x
        if inputs_keep is not None:
            x = x * inputs_keep
    return x


if __name__ == "__main__":
    key = jax.random.PRNGKey(0)
    k_inp, k_par = jax.random.split(key)

    # encode_size=128 keeps every lane dimension a multiple of 128 (MXU-friendly,
    # and required by the FFN wrapper's assert per the perf review).
    batch, slen, encode_size = 2, 16, 128
    n_block, n_conv, kernel_size = 1, 1, 7

    inputs = jax.random.normal(k_inp, (batch, slen, encode_size), jnp.float32)
    # pad mask: example 0 unpadded, example 1 has its last 4 positions padded
    inputs_mask = jnp.zeros((batch, slen), jnp.float32).at[1, slen - 4:].set(1.0)

    params = init_encoder_blocks_params(
        k_par, encode_size, n_block=n_block, n_conv=n_conv,
        kernel_size=kernel_size)

    out = jax.block_until_ready(
        encoder_blocks_forward(params, inputs, inputs_mask))
    ref = jax.block_until_ready(
        encoder_blocks_reference(params, inputs, inputs_mask))

    assert out.shape == inputs.shape
    # MXU matmul rounding (and the approx softmax reciprocal) vs the
    # HIGHEST-precision XLA reference differ slightly; tolerance reflects that.
    assert jnp.allclose(out, ref, atol=3e-2, rtol=3e-2), (
        "mismatch vs reference, max abs err "
        f"{float(jnp.max(jnp.abs(out - ref)))}")

    print("KERNEL_OK")
</pallas_src>

<mosaic_0001>
module attributes {stable_mosaic.version = 11 : i64} {
  func.func @_layer_norm_kernel(%arg0: i32, %arg1: memref<256x128xf32, #tpu.memory_space<vmem>>, %arg2: memref<1x128xf32, #tpu.memory_space<vmem>>, %arg3: memref<1x128xf32, #tpu.memory_space<vmem>>, %arg4: memref<256x128xf32, #tpu.memory_space<vmem>>) attributes {dimension_semantics = [#tpu.dimension_semantics<parallel>], iteration_bounds = array<i64: 1>, scalar_prefetch = 0 : i64, scratch_operands = 0 : i64, tpu.core_type = #tpu.core_type<tc>, window_params = [{transform_indices = @transform_0, window_bounds = array<i64: 256, 128>}, {pipeline_mode = #tpu.pipeline_mode<synchronous>, transform_indices = @transform_1, window_bounds = array<i64: 1, 128>}, {pipeline_mode = #tpu.pipeline_mode<synchronous>, transform_indices = @transform_2, window_bounds = array<i64: 1, 128>}, {transform_indices = @transform_3, window_bounds = array<i64: 256, 128>}]} {
    %c0 = arith.constant 0 : index
    %c0_0 = arith.constant 0 : index
    %0 = vector.load %arg1[%c0, %c0_0] : memref<256x128xf32, #tpu.memory_space<vmem>>, vector<256x128xf32>
    %cst = arith.constant dense<0.000000e+00> : vector<256xf32>
    %1 = vector.multi_reduction <add>, %0, %cst [1] : vector<256x128xf32> to vector<256xf32>
    %2 = vector.shape_cast %1 : vector<256xf32> to vector<256x1xf32>
    %cst_1 = arith.constant 1.280000e+02 : f32
    %3 = vector.broadcast %cst_1 : f32 to vector<256x1xf32>
    %4 = arith.divf %2, %3 : vector<256x1xf32>
    %5 = vector.broadcast %4 : vector<256x1xf32> to vector<256x128xf32>
    %6 = arith.subf %0, %5 : vector<256x128xf32>
    %7 = arith.mulf %6, %6 : vector<256x128xf32>
    %cst_2 = arith.constant dense<0.000000e+00> : vector<256xf32>
    %8 = vector.multi_reduction <add>, %7, %cst_2 [1] : vector<256x128xf32> to vector<256xf32>
    %9 = vector.shape_cast %8 : vector<256xf32> to vector<256x1xf32>
    %cst_3 = arith.constant 1.280000e+02 : f32
    %10 = vector.broadcast %cst_3 : f32 to vector<256x1xf32>
    %11 = arith.divf %9, %10 : vector<256x1xf32>
    %cst_4 = arith.constant 9.99999974E-6 : f32
    %12 = vector.broadcast %cst_4 : f32 to vector<256x1xf32>
    %13 = arith.addf %11, %12 : vector<256x1xf32>
    %14 = math.rsqrt %13 : vector<256x1xf32>
    %15 = vector.broadcast %14 : vector<256x1xf32> to vector<256x128xf32>
    %16 = arith.mulf %6, %15 : vector<256x128xf32>
    %c0_5 = arith.constant 0 : index
    %c0_6 = arith.constant 0 : index
    %17 = vector.load %arg2[%c0_5, %c0_6] : memref<1x128xf32, #tpu.memory_space<vmem>>, vector<1x128xf32>
    %18 = vector.broadcast %17 : vector<1x128xf32> to vector<256x128xf32>
    %19 = arith.mulf %16, %18 : vector<256x128xf32>
    %c0_7 = arith.constant 0 : index
    %c0_8 = arith.constant 0 : index
    %20 = vector.load %arg3[%c0_7, %c0_8] : memref<1x128xf32, #tpu.memory_space<vmem>>, vector<1x128xf32>
    %21 = vector.broadcast %20 : vector<1x128xf32> to vector<256x128xf32>
    %22 = arith.addf %19, %21 : vector<256x128xf32>
    %c0_9 = arith.constant 0 : index
    %c0_10 = arith.constant 0 : index
    %23 = vector.load %arg4[%c0_9, %c0_10] : memref<256x128xf32, #tpu.memory_space<vmem>>, vector<256x128xf32>
    tpu.vector_store %arg4[%c0_9, %c0_10], %22 {strides = array<i32>} : memref<256x128xf32, #tpu.memory_space<vmem>>, vector<256x128xf32>,
    return
  }
  func.func @transform_0(%arg0: i32) -> (i32, i32) {
    %c0_i32 = arith.constant 0 : i32
    %c0_i32_0 = arith.constant 0 : i32
    return %arg0, %c0_i32 : i32, i32
  }
  func.func @transform_1(%arg0: i32) -> (i32, i32) {
    %c0_i32 = arith.constant 0 : i32
    %c0_i32_0 = arith.constant 0 : i32
    %c0_i32_1 = arith.constant 0 : i32
    return %c0_i32, %c0_i32_0 : i32, i32
  }
  func.func @transform_2(%arg0: i32) -> (i32, i32) {
    %c0_i32 = arith.constant 0 : i32
    %c0_i32_0 = arith.constant 0 : i32
    %c0_i32_1 = arith.constant 0 : i32
    return %c0_i32, %c0_i32_0 : i32, i32
  }
  func.func @transform_3(%arg0: i32) -> (i32, i32) {
    %c0_i32 = arith.constant 0 : i32
    %c0_i32_0 = arith.constant 0 : i32
    return %arg0, %c0_i32 : i32, i32
  }
}

</mosaic_0001>

<bundles_post_ra>
// kernel: tpu_custom_call.1
= control target key start
LH: loop header
LB: loop body
LE: loop exit
PB: predicated region body
PF: predicated region fallthrough
CT: control target
= control target key end

     0   :  { %8 = vsyncpa [#allocation3], 0  ;;  %s1928_s0 = inlined_call_operand.hbm [shape: f32[256,128], index: 0, kind: input, shape index: {}]   ;;  %s1929_s1 = inlined_call_operand.hbm [shape: f32[1,128], index: 1, kind: input, shape index: {}]   ;;  %s1930_s2 = inlined_call_operand.vmem [shape: f32[1,128], index: 2, kind: input, shape index: {}]   ;;  %s1931_s3 = inlined_call_operand.hbm [shape: f32[256,128], index: 3, kind: output, shape index: {}]  }
   0x1   :  { %9 = vsyncpa [#allocation6], 0 }
   0x2   :  { %10 = vsyncpa [#allocation4], 0  ;;  %s15_s14 = sshll.u32 %s1928_s0, 4  ;;  %s1002_s15 = smov [#allocation2]   ;;  %s16_s14 = int_to_ptr.hbm [resolvable:$true] %s15_s14 }
   0x3   :  { %s17_s16 = sshll.u32 %s1002_s15, 4  ;;  %s29_s19 = sshll.u32 %s1929_s1, 4  ;;  %s18_s16 = int_to_ptr.vmem [resolvable:$true] %s17_s16  ;;  %s30_s19 = int_to_ptr.hbm [resolvable:$true] %s29_s19 }
   0x4   :  { %s1003_s20 = smov 128   ;;  %s1004_s21 = smov 8  }
   0x5   :  { %23 = dma.hbm_to_vmem [thread:$0]  %s16_s14, 4096, %s18_s16, [#allocation3], %s1003_s20, %s1003_s20, %s1004_s21  }
   0x6   :  { %s1005_s22 = smov [#allocation5]  }
   0x7   :  { %s31_s23 = sshll.u32 %s1005_s22, 4  ;;  %s32_s23 = int_to_ptr.vmem [resolvable:$true] %s31_s23 }
   0x8   :  { %34 = dma.hbm_to_vmem [thread:$0]  %s30_s19, 16, %s32_s23, [#allocation6]  }
   0x9   :  { %996 = dma.done.wait [#allocation3], 4096  }
   0xa   :  { %997 = vsyncadd [#allocation3], 4294963200 }
   0xb   :  { %998 = dma.done.wait [#allocation6], 16  }
   0xc   :  { %999 = vsyncadd [#allocation6], 4294967280  ;;  %v1037_v0 = vld [vmem:[#allocation2 + $0x20] sm:$0xff]  ;;  %v1039_v1 = vld [vmem:[#allocation2 + $0x10] sm:$0xff]  ;;  %v1006_v32 = vmov 128.0   ;;  %s1007_s24 = smov [#allocation7]  }
   0xd   :  { %v1041_v2 = vld [vmem:[#allocation2] sm:$0xff]  ;;  %85 = vadd.xlane.f32.xlu2 %v1037_v0  ;;  %81 = vadd.xlane.f32.xlu1 %v1039_v1  ;;  %v1046_v3 = vld [vmem:[#allocation2 + $0x28] sm:$0xff]  ;;  %v1048_v4 = vld [vmem:[#allocation2 + $0x18] sm:$0xff]  ;;  %856 = vrcp.f32 %v1006_v32  ;;  %s832_s25 = sshll.u32 %s1007_s24, 4  ;;  %s834_s28 = sshll.u32 %s1931_s3, 4  ;;  %s833_s25 = int_to_ptr.vmem [resolvable:$true] %s832_s25  ;;  %s835_s28 = int_to_ptr.hbm [resolvable:$true] %s834_s28 }
   0xe   :  { %77 = vadd.xlane.f32.xlu0 %v1041_v2  ;;  %v1050_v5 = vld [vmem:[#allocation2 + $0x8] sm:$0xff]  ;;  %v1055_v6 = vld [vmem:[#allocation2 + $0x40] sm:$0xff]  ;;  %v1057_v7 = vld [vmem:[#allocation2 + $0x38] sm:$0xff] }
   0xf   :  { %v1059_v8 = vld [vmem:[#allocation2 + $0x30] sm:$0xff]  ;;  %v1064_v9 = vld [vmem:[#allocation2 + $0x58] sm:$0xff]  ;;  %v1068_v11 = vld [vmem:[#allocation2 + $0x48] sm:$0xff] }
  0x10   :  { %v1066_v10 = vld [vmem:[#allocation2 + $0x50] sm:$0xff]  ;;  %v1075_v13 = vld [vmem:[#allocation2 + $0x68] sm:$0xff]  ;;  %v1077_v14 = vld [vmem:[#allocation2 + $0x60] sm:$0xff] }
  0x11   :  { %v1073_v12 = vld [vmem:[#allocation2 + $0x70] sm:$0xff]  ;;  %v1082_v15 = vld [vmem:[#allocation2 + $0x88] sm:$0xff]  ;;  %v1084_v16 = vld [vmem:[#allocation2 + $0x80] sm:$0xff] }
  0x12   :  { %v1086_v17 = vld [vmem:[#allocation2 + $0x78] sm:$0xff]  ;;  %v1091_v18 = vld [vmem:[#allocation2 + $0xa0] sm:$0xff]  ;;  %v1095_v20 = vld [vmem:[#allocation2 + $0x90] sm:$0xff] }
  0x13   :  { %v1093_v19 = vld [vmem:[#allocation2 + $0x98] sm:$0xff]  ;;  %v1102_v22 = vld [vmem:[#allocation2 + $0xb0] sm:$0xff]  ;;  %v1104_v23 = vld [vmem:[#allocation2 + $0xa8] sm:$0xff]  ;;  %v857_v33 = vpop.eup %856 }
  0x14   :  { %v1100_v21 = vld [vmem:[#allocation2 + $0xb8] sm:$0xff]  ;;  %v1109_v24 = vld [vmem:[#allocation2 + $0xd0] sm:$0xff]  ;;  %v1111_v25 = vld [vmem:[#allocation2 + $0xc8] sm:$0xff]  ;;  %v142_v34 = vmul.f32 128.0, %v857_v33  ;;  %vm146_vm0 = vweird.f32 %v857_v33 }
  0x15   :  { %87 = vadd.xlane.f32.xlu2 %v1046_v3  ;;  %83 = vadd.xlane.f32.xlu1 %v1048_v4  ;;  %v1113_v26 = vld [vmem:[#allocation2 + $0xc0] sm:$0xff]  ;;  %v1118_v27 = vld [vmem:[#allocation2 + $0xe8] sm:$0xff]  ;;  %v1122_v29 = vld [vmem:[#allocation2 + $0xd8] sm:$0xff] }
  0x16   :  { %79 = vadd.xlane.f32.xlu0 %v1050_v5  ;;  %v1120_v28 = vld [vmem:[#allocation2 + $0xe0] sm:$0xff]  ;;  %v1127_v30 = vld [vmem:[#allocation2 + $0xf8] sm:$0xff]  ;;  %v1129_v31 = vld [vmem:[#allocation2 + $0xf0] sm:$0xff]  ;;  %v143_v35 = vsub.f32 1.0, %v142_v34 }
  0x18   :  { %v144_v36 = vmul.f32 %v857_v33, %v143_v35 }
  0x1a   :  { %v145_v37 = vadd.f32 %v857_v33, %v144_v36 }
  0x1c   :  { %v1133_v38 = vsel %vm146_vm0, %v857_v33, %v145_v37 }
  0x1d   :  { %93 = vadd.xlane.f32.xlu2 %v1055_v6  ;;  %91 = vadd.xlane.f32.xlu1 %v1057_v7 }
  0x1e   :  { %89 = vadd.xlane.f32.xlu0 %v1059_v8 }
  0x25   :  { %99 = vadd.xlane.f32.xlu2 %v1064_v9  ;;  %97 = vadd.xlane.f32.xlu1 %v1066_v10 }
  0x26   :  { %95 = vadd.xlane.f32.xlu0 %v1068_v11 }
  0x2d   :  { %105 = vadd.xlane.f32.xlu2 %v1073_v12  ;;  %103 = vadd.xlane.f32.xlu1 %v1075_v13 }
  0x2e   :  { %101 = vadd.xlane.f32.xlu0 %v1077_v14 }
  0x35   :  { %111 = vadd.xlane.f32.xlu2 %v1082_v15  ;;  %109 = vadd.xlane.f32.xlu1 %v1084_v16 }
  0x36   :  { %107 = vadd.xlane.f32.xlu0 %v1086_v17 }
  0x3d   :  { %117 = vadd.xlane.f32.xlu2 %v1091_v18  ;;  %115 = vadd.xlane.f32.xlu1 %v1093_v19 }
  0x3e   :  { %113 = vadd.xlane.f32.xlu0 %v1095_v20 }
  0x45   :  { %123 = vadd.xlane.f32.xlu2 %v1100_v21  ;;  %121 = vadd.xlane.f32.xlu1 %v1102_v22 }
  0x46   :  { %119 = vadd.xlane.f32.xlu0 %v1104_v23 }
  0x4d   :  { %129 = vadd.xlane.f32.xlu2 %v1109_v24  ;;  %127 = vadd.xlane.f32.xlu1 %v1111_v25 }
  0x4e   :  { %125 = vadd.xlane.f32.xlu0 %v1113_v26 }
  0x55   :  { %135 = vadd.xlane.f32.xlu2 %v1118_v27  ;;  %133 = vadd.xlane.f32.xlu1 %v1120_v28 }
  0x56   :  { %131 = vadd.xlane.f32.xlu0 %v1122_v29 }
  0x5d   :  { %139 = vadd.xlane.f32.xlu1 %v1127_v30 }
  0x5e   :  { %137 = vadd.xlane.f32.xlu0 %v1129_v31 }
  0x80   :  { %v86_v39 = vpop.xlane.xlu2 %85  ;;  %v82_v40 = vpop.xlane.xlu1 %81 }
  0x81   :  { %v150_v41 = vmul.f32 %v1133_v38, %v82_v40  ;;  %v78_v42 = vpop.xlane.xlu0 %77  ;;  %v152_v56 = vmul.f32 %v1133_v38, %v86_v39 }
  0x82   :  { %v148_v43 = vmul.f32 %v1133_v38, %v78_v42 }
  0x83   :  { %v1138_v44 = vsub.f32 %v1039_v1, %v150_v41  ;;  %v1167_v61 = vsub.f32 %v1037_v0, %v152_v56 }
  0x84   :  { %v1141_v45 = vsub.f32 %v1041_v2, %v148_v43 }
  0x85   :  { %v214_v46 = vmul.f32 %v1138_v44, %v1138_v44  ;;  %v216_v32 = vmul.f32 %v1167_v61, %v1167_v61 }
  0x86   :  { %v212_v47 = vmul.f32 %v1141_v45, %v1141_v45 }
  0x87   :  { %248 = vadd.xlane.f32.xlu1 %v214_v46 }
  0x88   :  { %244 = vadd.xlane.f32.xlu2 %v212_v47  ;;  %v88_v48 = vpop.xlane.xlu2 %87  ;;  %v84_v49 = vpop.xlane.xlu1 %83 }
  0x89   :  { %v153_v50 = vmul.f32 %v1133_v38, %v88_v48  ;;  %v151_v51 = vmul.f32 %v1133_v38, %v84_v49  ;;  %v80_v52 = vpop.xlane.xlu0 %79 }
  0x8a   :  { %v149_v53 = vmul.f32 %v1133_v38, %v80_v52 }
  0x8b   :  { %v1151_v54 = vsub.f32 %v1046_v3, %v153_v50  ;;  %v1154_v55 = vsub.f32 %v1048_v4, %v151_v51 }
  0x8c   :  { %v1158_v57 = vsub.f32 %v1050_v5, %v149_v53 }
  0x8d   :  { %v217_v58 = vmul.f32 %v1151_v54, %v1151_v54  ;;  %v215_v59 = vmul.f32 %v1154_v55, %v1154_v55 }
  0x8e   :  { %v213_v60 = vmul.f32 %v1158_v57, %v1158_v57 }
  0x8f   :  { %254 = vadd.xlane.f32.xlu1 %v217_v58 }
  0x90   :  { %250 = vadd.xlane.f32.xlu2 %v215_v59  ;;  %246 = vadd.xlane.f32.xlu0 %v213_v60  ;;  %v94_v62 = vpop.xlane.xlu2 %93  ;;  %v92_v63 = vpop.xlane.xlu1 %91 }
  0x91   :  { %v156_v1 = vmul.f32 %v1133_v38, %v94_v62  ;;  %v90_v2 = vpop.xlane.xlu0 %89  ;;  %v155_v0 = vmul.f32 %v1133_v38, %v92_v63 }
  0x92   :  { %v154_v3 = vmul.f32 %v1133_v38, %v90_v2 }
  0x93   :  { %v1172_v4 = vsub.f32 %v1055_v6, %v156_v1  ;;  %v1185_v6 = vsub.f32 %v1057_v7, %v155_v0 }
  0x94   :  { %v1175_v5 = vsub.f32 %v1059_v8, %v154_v3 }
  0x95   :  { %v220_v33 = vmul.f32 %v1172_v4, %v1172_v4  ;;  %v219_v42 = vmul.f32 %v1185_v6, %v1185_v6 }
  0x96   :  { %v218_v34 = vmul.f32 %v1175_v5, %v1175_v5 }
  0x97   :  { %260 = vadd.xlane.f32.xlu1 %v220_v33 }
  0x98   :  { %252 = vadd.xlane.f32.xlu0 %v216_v32  ;;  %256 = vadd.xlane.f32.xlu2 %v218_v34  ;;  %v100_v35 = vpop.xlane.xlu2 %99  ;;  %v98_v8 = vpop.xlane.xlu1 %97 }
  0x99   :  { %v159_v36 = vmul.f32 %v1133_v38, %v100_v35  ;;  %v96_v37 = vpop.xlane.xlu0 %95  ;;  %v158_v43 = vmul.f32 %v1133_v38, %v98_v8 }
  0x9a   :  { %v157_v39 = vmul.f32 %v1133_v38, %v96_v37 }
  0x9b   :  { %v1190_v40 = vsub.f32 %v1064_v9, %v159_v36  ;;  %v1203_v9 = vsub.f32 %v1066_v10, %v158_v43 }
  0x9c   :  { %v1193_v41 = vsub.f32 %v1068_v11, %v157_v39 }
  0x9d   :  { %v223_v7 = vmul.f32 %v1190_v40, %v1190_v40  ;;  %v222_v53 = vmul.f32 %v1203_v9, %v1203_v9 }
  0x9e   :  { %v221_v46 = vmul.f32 %v1193_v41, %v1193_v41 }
  0x9f   :  { %266 = vadd.xlane.f32.xlu1 %v223_v7 }
  0xa0   :  { %258 = vadd.xlane.f32.xlu0 %v219_v42  ;;  %262 = vadd.xlane.f32.xlu2 %v221_v46  ;;  %v106_v47 = vpop.xlane.xlu2 %105  ;;  %v104_v11 = vpop.xlane.xlu1 %103 }
  0xa1   :  { %v162_v48 = vmul.f32 %v1133_v38, %v106_v47  ;;  %v102_v49 = vpop.xlane.xlu0 %101  ;;  %v161_v56 = vmul.f32 %v1133_v38, %v104_v11 }
  0xa2   :  { %v160_v50 = vmul.f32 %v1133_v38, %v102_v49 }
  0xa3   :  { %v1208_v51 = vsub.f32 %v1073_v12, %v162_v48  ;;  %v1221_v12 = vsub.f32 %v1075_v13, %v161_v56 }
  0xa4   :  { %v1211_v52 = vsub.f32 %v1077_v14, %v160_v50 }
  0xa5   :  { %v226_v10 = vmul.f32 %v1208_v51, %v1208_v51  ;;  %v225_v3 = vmul.f32 %v1221_v12, %v1221_v12 }
  0xa6   :  { %v224_v58 = vmul.f32 %v1211_v52, %v1211_v52 }
  0xa7   :  { %272 = vadd.xlane.f32.xlu1 %v226_v10 }
  0xa8   :  { %264 = vadd.xlane.f32.xlu0 %v222_v53  ;;  %268 = vadd.xlane.f32.xlu2 %v224_v58  ;;  %v112_v59 = vpop.xlane.xlu2 %111  ;;  %v110_v14 = vpop.xlane.xlu1 %109 }
  0xa9   :  { %v165_v60 = vmul.f32 %v1133_v38, %v112_v59  ;;  %v108_v62 = vpop.xlane.xlu0 %107  ;;  %v164_v32 = vmul.f32 %v1133_v38, %v110_v14 }
  0xaa   :  { %v163_v63 = vmul.f32 %v1133_v38, %v108_v62 }
  0xab   :  { %v1226_v1 = vsub.f32 %v1082_v15, %v165_v60  ;;  %v1239_v15 = vsub.f32 %v1084_v16, %v164_v32 }
  0xac   :  { %v1229_v2 = vsub.f32 %v1086_v17, %v163_v63 }
  0xad   :  { %v229_v13 = vmul.f32 %v1226_v1, %v1226_v1  ;;  %v228_v39 = vmul.f32 %v1239_v15, %v1239_v15 }
  0xae   :  { %v227_v0 = vmul.f32 %v1229_v2, %v1229_v2 }
  0xaf   :  { %278 = vadd.xlane.f32.xlu1 %v229_v13 }
  0xb0   :  { %270 = vadd.xlane.f32.xlu0 %v225_v3  ;;  %274 = vadd.xlane.f32.xlu2 %v227_v0  ;;  %v118_v33 = vpop.xlane.xlu2 %117  ;;  %v116_v17 = vpop.xlane.xlu1 %115 }
  0xb1   :  { %v168_v34 = vmul.f32 %v1133_v38, %v118_v33  ;;  %v114_v35 = vpop.xlane.xlu0 %113  ;;  %v167_v42 = vmul.f32 %v1133_v38, %v116_v17 }
  0xb2   :  { %v166_v8 = vmul.f32 %v1133_v38, %v114_v35 }
  0xb3   :  { %v1244_v36 = vsub.f32 %v1091_v18, %v168_v34  ;;  %v1257_v18 = vsub.f32 %v1093_v19, %v167_v42 }
  0xb4   :  { %v1247_v37 = vsub.f32 %v1095_v20, %v166_v8 }
  0xb5   :  { %v232_v16 = vmul.f32 %v1244_v36, %v1244_v36  ;;  %v231_v50 = vmul.f32 %v1257_v18, %v1257_v18 }
  0xb6   :  { %v230_v43 = vmul.f32 %v1247_v37, %v1247_v37 }
  0xb7   :  { %284 = vadd.xlane.f32.xlu1 %v232_v16 }
  0xb8   :  { %276 = vadd.xlane.f32.xlu0 %v228_v39  ;;  %280 = vadd.xlane.f32.xlu2 %v230_v43  ;;  %v124_v7 = vpop.xlane.xlu2 %123  ;;  %v122_v20 = vpop.xlane.xlu1 %121 }
  0xb9   :  { %v171_v46 = vmul.f32 %v1133_v38, %v124_v7  ;;  %v120_v47 = vpop.xlane.xlu0 %119  ;;  %v170_v53 = vmul.f32 %v1133_v38, %v122_v20 }
  0xba   :  { %v169_v11 = vmul.f32 %v1133_v38, %v120_v47 }
  0xbb   :  { %v1262_v48 = vsub.f32 %v1100_v21, %v171_v46  ;;  %v1275_v21 = vsub.f32 %v1102_v22, %v170_v53 }
  0xbc   :  { %v1265_v49 = vsub.f32 %v1104_v23, %v169_v11 }
  0xbd   :  { %v235_v19 = vmul.f32 %v1262_v48, %v1262_v48  ;;  %v234_v63 = vmul.f32 %v1275_v21, %v1275_v21 }
  0xbe   :  { %v233_v56 = vmul.f32 %v1265_v49, %v1265_v49 }
  0xbf   :  { %290 = vadd.xlane.f32.xlu1 %v235_v19 }
  0xc0   :  { %282 = vadd.xlane.f32.xlu0 %v231_v50  ;;  %286 = vadd.xlane.f32.xlu2 %v233_v56  ;;  %v130_v10 = vpop.xlane.xlu2 %129  ;;  %v128_v23 = vpop.xlane.xlu1 %127 }
  0xc1   :  { %v174_v58 = vmul.f32 %v1133_v38, %v130_v10  ;;  %v126_v59 = vpop.xlane.xlu0 %125  ;;  %v173_v3 = vmul.f32 %v1133_v38, %v128_v23 }
  0xc2   :  { %v172_v14 = vmul.f32 %v1133_v38, %v126_v59 }
  0xc3   :  { %v1280_v60 = vsub.f32 %v1109_v24, %v174_v58  ;;  %v1293_v24 = vsub.f32 %v1111_v25, %v173_v3 }
  0xc4   :  { %v1283_v62 = vsub.f32 %v1113_v26, %v172_v14 }
  0xc5   :  { %v238_v22 = vmul.f32 %v1280_v60, %v1280_v60  ;;  %v237_v8 = vmul.f32 %v1293_v24, %v1293_v24 }
  0xc6   :  { %v236_v32 = vmul.f32 %v1283_v62, %v1283_v62 }
  0xc7   :  { %296 = vadd.xlane.f32.xlu1 %v238_v22 }
  0xc8   :  { %288 = vadd.xlane.f32.xlu0 %v234_v63  ;;  %292 = vadd.xlane.f32.xlu2 %v236_v32  ;;  %v136_v13 = vpop.xlane.xlu2 %135  ;;  %v134_v26 = vpop.xlane.xlu1 %133 }
  0xc9   :  { %v177_v0 = vmul.f32 %v1133_v38, %v136_v13  ;;  %v132_v33 = vpop.xlane.xlu0 %131  ;;  %v176_v39 = vmul.f32 %v1133_v38, %v134_v26 }
  0xca   :  { %v175_v17 = vmul.f32 %v1133_v38, %v132_v33 }
  0xcb   :  { %v1298_v34 = vsub.f32 %v1118_v27, %v177_v0  ;;  %v1311_v27 = vsub.f32 %v1120_v28, %v176_v39 }
  0xcc   :  { %v1301_v35 = vsub.f32 %v1122_v29, %v175_v17 }
  0xcd   :  { %v241_v25 = vmul.f32 %v1298_v34, %v1298_v34  ;;  %v240_v20 = vmul.f32 %v1311_v27, %v1311_v27 }
  0xce   :  { %v239_v42 = vmul.f32 %v1301_v35, %v1301_v35 }
  0xcf   :  { %302 = vadd.xlane.f32.xlu1 %v241_v25 }
  0xd0   :  { %294 = vadd.xlane.f32.xlu0 %v237_v8  ;;  %298 = vadd.xlane.f32.xlu2 %v239_v42  ;;  %v140_v29 = vpop.xlane.xlu1 %139 }
  0xd1   :  { %v138_v16 = vpop.xlane.xlu0 %137  ;;  %v179_v46 = vmul.f32 %v1133_v38, %v140_v29 }
  0xd2   :  { %v178_v43 = vmul.f32 %v1133_v38, %v138_v16 }
  0xd3   :  { %v1323_v28 = vsub.f32 %v1127_v30, %v179_v46 }
  0xd4   :  { %v1315_v7 = vsub.f32 %v1129_v31, %v178_v43 }
  0xd5   :  { %v243_v11 = vmul.f32 %v1323_v28, %v1323_v28 }
  0xd6   :  { %v242_v47 = vmul.f32 %v1315_v7, %v1315_v7 }
  0xd8   :  { %300 = vadd.xlane.f32.xlu0 %v240_v20  ;;  %304 = vadd.xlane.f32.xlu2 %v242_v47 }
  0xe0   :  { %306 = vadd.xlane.f32.xlu0 %v243_v11 }
  0xfa   :  { %v249_v50 = vpop.xlane.xlu1 %248 }
  0xfb   :  { %v310_v31 = vmul.f32 %v249_v50, %v1133_v38  ;;  %v245_v53 = vpop.xlane.xlu2 %244 }
  0xfc   :  { %v308_v19 = vmul.f32 %v245_v53, %v1133_v38 }
  0xfd   :  { %v342_v56 = vadd.f32 1e-05, %v310_v31 }
  0xfe   :  { %v340_v10 = vadd.f32 1e-05, %v308_v19 }
  0xff   :  { %858 = vrsqrt.f32 %v342_v56  ;;  %vm398_vm1 = vweird.f32 %v342_v56 }
 0x100   :  { %860 = vrsqrt.f32 %v340_v10  ;;  %vm378_vm3 = vweird.f32 %v340_v10 }
 0x102   :  { %v255_v23 = vpop.xlane.xlu1 %254 }
 0x103   :  { %v313_v58 = vmul.f32 %v255_v23, %v1133_v38  ;;  %v251_v59 = vpop.xlane.xlu2 %250  ;;  %v247_v30 = vpop.xlane.xlu0 %246 }
 0x104   :  { %v311_v14 = vmul.f32 %v251_v59, %v1133_v38  ;;  %v309_v63 = vmul.f32 %v247_v30, %v1133_v38  ;;  %v1357_v59 = vld [vmem:[#allocation5] ss:$0 sm:$0xff] }
 0x105   :  { %v859_v3 = vpop.eup %858  ;;  %v1332_v22 = vadd.f32 1e-05, %v313_v58 }
 0x106   :  { %v861_v32 = vpop.eup %860  ;;  %v393_v13 = vmul.f32 %v859_v3, %v342_v56  ;;  %v1334_v26 = vadd.f32 1e-05, %v311_v14  ;;  %v1336_v0 = vadd.f32 1e-05, %v309_v63  ;;  %vm399_vm2 = vweird.f32 %v859_v3  ;;  %v1374_v56 = vld [vmem:[%s1930_s2] ss:$0 sm:$0xff] }
 0x107   :  { %v373_v33 = vmul.f32 %v861_v32, %v340_v10  ;;  %862 = vrsqrt.f32 %v1332_v22  ;;  %vm379_vm4 = vweird.f32 %v861_v32  ;;  %vm428_vm5 = vweird.f32 %v1332_v22  ;;  %vm400_vm7 = vmor %vm398_vm1, %vm399_vm2 }
 0x108   :  { %v394_v17 = vmul.f32 %v859_v3, %v393_v13  ;;  %864 = vrsqrt.f32 %v1334_v26  ;;  %vm408_vm6 = vweird.f32 %v1334_v26  ;;  %vm380_vm8 = vmor %vm378_vm3, %vm379_vm4  ;;  %vm388_vm9 = vweird.f32 %v1336_v0 }
 0x109   :  { %v374_v8 = vmul.f32 %v861_v32, %v373_v33  ;;  %866 = vrsqrt.f32 %v1336_v0 }
 0x10a   :  { %v395_v39 = vmul.f32 0.5, %v394_v17  ;;  %v261_v25 = vpop.xlane.xlu1 %260 }
 0x10b   :  { %v375_v42 = vmul.f32 0.5, %v374_v8  ;;  %v316_v16 = vmul.f32 %v261_v25, %v1133_v38  ;;  %v257_v29 = vpop.xlane.xlu2 %256  ;;  %v253_v43 = vpop.xlane.xlu0 %252 }
 0x10c   :  { %v396_v20 = vsub.f32 1.5, %v395_v39  ;;  %v314_v46 = vmul.f32 %v257_v29, %v1133_v38  ;;  %v312_v63 = vmul.f32 %v253_v43, %v1133_v38 }
 0x10d   :  { %v1343_v47 = vpop.eup %862  ;;  %v376_v11 = vsub.f32 1.5, %v375_v42  ;;  %v1346_v50 = vadd.f32 1e-05, %v316_v16 }
 0x10e   :  { %v1348_v31 = vpop.eup %864  ;;  %v397_v53 = vmul.f32 %v859_v3, %v396_v20  ;;  %v423_v19 = vmul.f32 %v1343_v47, %v1332_v22  ;;  %v1353_v23 = vadd.f32 1e-05, %v314_v46  ;;  %vm429_vm10 = vweird.f32 %v1343_v47 }
 0x10f   :  { %v1355_v58 = vpop.eup %866  ;;  %v377_v30 = vmul.f32 %v861_v32, %v376_v11  ;;  %v403_v14 = vmul.f32 %v1348_v31, %v1334_v26  ;;  %868 = vrsqrt.f32 %v1346_v50  ;;  %vm409_vm11 = vweird.f32 %v1348_v31  ;;  %vm1395_vm12 = vmor %vm428_vm5, %vm429_vm10 }
 0x110   :  { %v401_v13 = vsel %vm400_vm7, %v859_v3, %v397_v53  ;;  %v424_v33 = vmul.f32 %v1343_v47, %v423_v19  ;;  %v383_v17 = vmul.f32 %v1355_v58, %v1336_v0  ;;  %870 = vrsqrt.f32 %v1353_v23  ;;  %vm410_vm0 = vmor %vm408_vm6, %vm409_vm11 }
 0x111   :  { %v694_v8 = vmul.f32 %v401_v13, %v1138_v44  ;;  %v381_v39 = vsel %vm380_vm8, %v861_v32, %v377_v30  ;;  %v404_v10 = vmul.f32 %v1348_v31, %v403_v14  ;;  %v1384_v20 = vadd.f32 1e-05, %v312_v63 }
 0x112   :  { %v692_v3 = vmul.f32 %v381_v39, %v1141_v45  ;;  %v425_v25 = vmul.f32 0.5, %v424_v33  ;;  %v384_v42 = vmul.f32 %v1355_v58, %v383_v17  ;;  %v267_v16 = vpop.xlane.xlu1 %266  ;;  %vm389_vm13 = vweird.f32 %v1355_v58 }
 0x113   :  { %v730_v29 = vmul.f32 %v1357_v59, %v694_v8  ;;  %v405_v43 = vmul.f32 0.5, %v404_v10  ;;  %v263_v44 = vpop.xlane.xlu2 %262  ;;  %v259_v32 = vpop.xlane.xlu0 %258  ;;  %v319_v45 = vmul.f32 %v267_v16, %v1133_v38  ;;  %872 = vrsqrt.f32 %v1384_v20  ;;  %vm390_vm1 = vmor %vm388_vm9, %vm389_vm13 }
 0x114   :  { %v728_v46 = vmul.f32 %v1357_v59, %v692_v3  ;;  %v426_v11 = vsub.f32 1.5, %v425_v25  ;;  %v385_v53 = vmul.f32 0.5, %v384_v42  ;;  %vm458_vm14 = vweird.f32 %v1346_v50 }
 0x115   :  { %v1388_v19 = vpop.eup %868  ;;  %v766_v30 = vadd.f32 %v1374_v56, %v730_v29  ;;  %v406_v63 = vsub.f32 1.5, %v405_v43  ;;  %v1408_v39 = vadd.f32 1e-05, %v319_v45  ;;  %v317_v16 = vmul.f32 %v263_v44, %v1133_v38 }
 0x116   :  { %v764_v13 = vadd.f32 %v1374_v56, %v728_v46  ;;  %v427_v33 = vmul.f32 %v1343_v47, %v426_v11  ;;  %v386_v17 = vsub.f32 1.5, %v385_v53  ;;  %v453_v8 = vmul.f32 %v1388_v19, %v1346_v50  ;;  %v1410_v10 = vpop.eup %870 }
 0x117   :  { %798 = vst [vmem:[#allocation7 + $0x10] sm:$0xff] %v766_v30  ;;  %v407_v22 = vmul.f32 %v1348_v31, %v406_v63  ;;  %vm459_vm15 = vweird.f32 %v1388_v19  ;;  %v315_v26 = vmul.f32 %v259_v32, %v1133_v38  ;;  %874 = vrsqrt.f32 %v1408_v39 }
 0x118   :  { %796 = vst [vmem:[#allocation7] sm:$0xff] %v764_v13  ;;  %v431_v3 = vsel %vm1395_vm12, %v1343_v47, %v427_v33  ;;  %v387_v25 = vmul.f32 %v1355_v58, %v386_v17  ;;  %v454_v42 = vmul.f32 %v1388_v19, %v453_v8  ;;  %v433_v47 = vmul.f32 %v1410_v10, %v1353_v23  ;;  %vm1449_vm3 = vmor %vm458_vm14, %vm459_vm15 }
 0x119   :  { %v697_v29 = vmul.f32 %v431_v3, %v1151_v54  ;;  %v411_v43 = vsel %vm410_vm0, %v1348_v31, %v407_v22  ;;  %v1434_v44 = vpop.eup %872  ;;  %vm438_vm2 = vweird.f32 %v1353_v23  ;;  %v1453_v17 = vadd.f32 1e-05, %v317_v16 }
 0x11a   :  { %v695_v46 = vmul.f32 %v411_v43, %v1154_v55  ;;  %v391_v11 = vsel %vm390_vm1, %v1355_v58, %v387_v25  ;;  %v455_v53 = vmul.f32 0.5, %v454_v42  ;;  %v273_v54 = vpop.xlane.xlu1 %272  ;;  %v434_v45 = vmul.f32 %v1410_v10, %v433_v47 }
 0x11b   :  { %v733_v31 = vmul.f32 %v1357_v59, %v697_v29  ;;  %v693_v0 = vmul.f32 %v391_v11, %v1158_v57  ;;  %v269_v30 = vpop.xlane.xlu2 %268  ;;  %v265_v14 = vpop.xlane.xlu0 %264  ;;  %v413_v55 = vmul.f32 %v1434_v44, %v1384_v20  ;;  %v1458_v25 = vadd.f32 1e-05, %v315_v26 }
 0x11c   :  { %v731_v32 = vmul.f32 %v1357_v59, %v695_v46  ;;  %v456_v63 = vsub.f32 1.5, %v455_v53  ;;  %v435_v33 = vmul.f32 0.5, %v434_v45  ;;  %vm439_vm4 = vweird.f32 %v1410_v10 }
 0x11d   :  { %v769_v58 = vadd.f32 %v1374_v56, %v733_v31  ;;  %v729_v13 = vmul.f32 %v1357_v59, %v693_v0  ;;  %v414_v3 = vmul.f32 %v1434_v44, %v413_v55  ;;  %876 = vrsqrt.f32 %v1453_v17  ;;  %v1463_v50 = vpop.eup %874  ;;  %vm440_vm7 = vmor %vm438_vm2, %vm439_vm4 }
 0x11e   :  { %v767_v8 = vadd.f32 %v1374_v56, %v731_v32  ;;  %v457_v22 = vmul.f32 %v1388_v19, %v456_v63  ;;  %v436_v29 = vsub.f32 1.5, %v435_v33  ;;  %vm418_vm5 = vweird.f32 %v1384_v20 }
 0x11f   :  { %801 = vst [vmem:[#allocation7 + $0x28] sm:$0xff] %v769_v58  ;;  %v765_v42 = vadd.f32 %v1374_v56, %v729_v13  ;;  %v415_v43 = vmul.f32 0.5, %v414_v3  ;;  %878 = vrsqrt.f32 %v1458_v25  ;;  %vm419_vm6 = vweird.f32 %v1434_v44 }
 0x120   :  { %799 = vst [vmem:[#allocation7 + $0x18] sm:$0xff] %v767_v8  ;;  %v461_v16 = vsel %vm1449_vm3, %v1388_v19, %v457_v22  ;;  %v437_v26 = vmul.f32 %v1410_v10, %v436_v29  ;;  %v483_v46 = vmul.f32 %v1463_v50, %v1408_v39  ;;  %v322_v19 = vmul.f32 %v273_v54, %v1133_v38  ;;  %vm420_vm9 = vmor %vm418_vm5, %vm419_vm6 }
 0x121   :  { %797 = vst [vmem:[#allocation7 + $0x8] sm:$0xff] %v765_v42  ;;  %v700_v47 = vmul.f32 %v461_v16, %v1172_v4  ;;  %v416_v11 = vsub.f32 1.5, %v415_v43  ;;  %v320_v53 = vmul.f32 %v269_v30, %v1133_v38  ;;  %v318_v31 = vmul.f32 %v265_v14, %v1133_v38 }
 0x122   :  { %v279_v0 = vpop.xlane.xlu1 %278  ;;  %v441_v45 = vsel %vm440_vm7, %v1410_v10, %v437_v26  ;;  %v484_v32 = vmul.f32 %v1463_v50, %v483_v46  ;;  %vm488_vm8 = vweird.f32 %v1408_v39  ;;  %v1487_v54 = vadd.f32 1e-05, %v322_v19 }
 0x123   :  { %v736_v4 = vmul.f32 %v1357_v59, %v700_v47  ;;  %v325_v63 = vmul.f32 %v279_v0, %v1133_v38  ;;  %v275_v55 = vpop.xlane.xlu2 %274  ;;  %v271_v58 = vpop.xlane.xlu0 %270  ;;  %v698_v23 = vmul.f32 %v441_v45, %v1175_v5  ;;  %v417_v13 = vmul.f32 %v1434_v44, %v416_v11 }
 0x124   :  { %v1489_v30 = vpop.eup %876  ;;  %v485_v10 = vmul.f32 0.5, %v484_v32  ;;  %vm489_vm10 = vweird.f32 %v1463_v50  ;;  %v1497_v57 = vadd.f32 1e-05, %v320_v53  ;;  %v1505_v3 = vadd.f32 1e-05, %v318_v31 }
 0x125   :  { %v772_v14 = vadd.f32 %v1374_v56, %v736_v4  ;;  %v1499_v5 = vpop.eup %878  ;;  %v734_v33 = vmul.f32 %v1357_v59, %v698_v23  ;;  %v421_v8 = vsel %vm420_vm9, %v1434_v44, %v417_v13  ;;  %v463_v22 = vmul.f32 %v1489_v30, %v1453_v17  ;;  %vm1515_vm11 = vmor %vm488_vm8, %vm489_vm10 }
 0x126   :  { %v696_v20 = vmul.f32 %v421_v8, %v1167_v61  ;;  %v486_v42 = vsub.f32 1.5, %v485_v10  ;;  %v443_v29 = vmul.f32 %v1499_v5, %v1458_v25  ;;  %v1510_v16 = vadd.f32 1e-05, %v325_v63 }
 0x127   :  { %804 = vst [vmem:[#allocation7 + $0x40] sm:$0xff] %v772_v14  ;;  %v770_v43 = vadd.f32 %v1374_v56, %v734_v33  ;;  %v464_v47 = vmul.f32 %v1489_v30, %v463_v22  ;;  %vm468_vm12 = vweird.f32 %v1453_v17  ;;  %880 = vrsqrt.f32 %v1487_v54 }
 0x128   :  { %v732_v61 = vmul.f32 %v1357_v59, %v696_v20  ;;  %v487_v26 = vmul.f32 %v1463_v50, %v486_v42  ;;  %v444_v46 = vmul.f32 %v1499_v5, %v443_v29  ;;  %882 = vrsqrt.f32 %v1497_v57 }
 0x129   :  { %802 = vst [vmem:[#allocation7 + $0x30] sm:$0xff] %v770_v43  ;;  %v465_v39 = vmul.f32 0.5, %v464_v47  ;;  %vm469_vm13 = vweird.f32 %v1489_v30  ;;  %vm448_vm14 = vweird.f32 %v1458_v25  ;;  %884 = vrsqrt.f32 %v1505_v3 }
 0x12a   :  { %v768_v11 = vadd.f32 %v1374_v56, %v732_v61  ;;  %v491_v19 = vsel %vm1515_vm11, %v1463_v50, %v487_v26  ;;  %v445_v53 = vmul.f32 0.5, %v444_v46  ;;  %886 = vrsqrt.f32 %v1510_v16  ;;  %v285_v31 = vpop.xlane.xlu1 %284  ;;  %vm470_vm3 = vmor %vm468_vm12, %vm469_vm13 }
 0x12b   :  { %v281_v0 = vpop.xlane.xlu2 %280  ;;  %v703_v4 = vmul.f32 %v491_v19, %v1190_v40  ;;  %v466_v45 = vsub.f32 1.5, %v465_v39  ;;  %vm449_vm15 = vweird.f32 %v1499_v5  ;;  %v323_v32 = vmul.f32 %v275_v55, %v1133_v38  ;;  %v277_v63 = vpop.xlane.xlu0 %276 }
 0x12c   :  { %800 = vst [vmem:[#allocation7 + $0x20] sm:$0xff] %v768_v11  ;;  %v446_v23 = vsub.f32 1.5, %v445_v53  ;;  %vm518_vm0 = vweird.f32 %v1487_v54  ;;  %vm498_vm1 = vweird.f32 %v1497_v57  ;;  %v321_v50 = vmul.f32 %v271_v58, %v1133_v38  ;;  %vm450_vm4 = vmor %vm448_vm14, %vm449_vm15 }
 0x12d   :  { %v1540_v13 = vpop.eup %880  ;;  %v739_v14 = vmul.f32 %v1357_v59, %v703_v4  ;;  %v467_v40 = vmul.f32 %v1489_v30, %v466_v45  ;;  %vm548_vm2 = vweird.f32 %v1510_v16  ;;  %v328_v10 = vmul.f32 %v285_v31, %v1133_v38 }
 0x12e   :  { %v326_v55 = vmul.f32 %v281_v0, %v1133_v38  ;;  %v1547_v33 = vpop.eup %882  ;;  %v447_v58 = vmul.f32 %v1499_v5, %v446_v23  ;;  %v513_v8 = vmul.f32 %v1540_v13, %v1487_v54  ;;  %v1556_v22 = vadd.f32 1e-05, %v323_v32 }
 0x12f   :  { %v324_v20 = vmul.f32 %v277_v63, %v1133_v38  ;;  %v1559_v42 = vpop.eup %884  ;;  %v775_v29 = vadd.f32 %v1374_v56, %v739_v14  ;;  %v471_v43 = vsel %vm470_vm3, %v1489_v30, %v467_v40  ;;  %vm519_vm5 = vweird.f32 %v1540_v13 }
 0x130   :  { %v493_v17 = vmul.f32 %v1547_v33, %v1497_v57  ;;  %v887_v44 = vpop.eup %886  ;;  %v701_v47 = vmul.f32 %v471_v43, %v1193_v41  ;;  %v451_v61 = vsel %vm450_vm4, %v1499_v5, %v447_v58  ;;  %v514_v26 = vmul.f32 %v1540_v13, %v513_v8  ;;  %vm1591_vm8 = vmor %vm518_vm0, %vm519_vm5 }
 0x131   :  { %v473_v30 = vmul.f32 %v1559_v42, %v1505_v3  ;;  %807 = vst [vmem:[#allocation7 + $0x58] sm:$0xff] %v775_v29  ;;  %v699_v46 = vmul.f32 %v451_v61, %v1185_v6  ;;  %v543_v39 = vmul.f32 %v887_v44, %v1510_v16  ;;  %v1578_v11 = vadd.f32 1e-05, %v321_v50 }
 0x132   :  { %v494_v25 = vmul.f32 %v1547_v33, %v493_v17  ;;  %v737_v19 = vmul.f32 %v1357_v59, %v701_v47  ;;  %v515_v53 = vmul.f32 0.5, %v514_v26  ;;  %vm499_vm6 = vweird.f32 %v1547_v33 }
 0x133   :  { %v474_v41 = vmul.f32 %v1559_v42, %v473_v30  ;;  %v735_v5 = vmul.f32 %v1357_v59, %v699_v46  ;;  %v544_v0 = vmul.f32 %v887_v44, %v543_v39  ;;  %888 = vrsqrt.f32 %v1556_v22  ;;  %v1600_v8 = vpop.xlane.xlu0 %282  ;;  %vm1607_vm10 = vmor %vm498_vm1, %vm499_vm6 }
 0x134   :  { %v495_v31 = vmul.f32 0.5, %v494_v25  ;;  %v773_v6 = vadd.f32 %v1374_v56, %v737_v19  ;;  %v516_v4 = vsub.f32 1.5, %v515_v53  ;;  %vm549_vm7 = vweird.f32 %v887_v44 }
 0x135   :  { %v475_v45 = vmul.f32 0.5, %v474_v41  ;;  %v771_v32 = vadd.f32 %v1374_v56, %v735_v5  ;;  %v545_v50 = vmul.f32 0.5, %v544_v0  ;;  %890 = vrsqrt.f32 %v1578_v11  ;;  %vm1621_vm12 = vmor %vm548_vm2, %vm549_vm7 }
 0x136   :  { %v496_v23 = vsub.f32 1.5, %v495_v31  ;;  %805 = vst [vmem:[#allocation7 + $0x48] sm:$0xff] %v773_v6  ;;  %v517_v14 = vmul.f32 %v1540_v13, %v516_v4  ;;  %vm479_vm9 = vweird.f32 %v1559_v42  ;;  %v1598_v58 = vadd.f32 1e-05, %v328_v10  ;;  %v287_v10 = vpop.xlane.xlu2 %286 }
 0x137   :  { %v476_v40 = vsub.f32 1.5, %v475_v45  ;;  %803 = vst [vmem:[#allocation7 + $0x38] sm:$0xff] %v771_v32  ;;  %vm478_vm11 = vweird.f32 %v1505_v3  ;;  %v546_v43 = vsub.f32 1.5, %v545_v50  ;;  %v1612_v17 = vadd.f32 1e-05, %v326_v55  ;;  %v291_v55 = vpop.xlane.xlu1 %290 }
 0x138   :  { %v497_v54 = vmul.f32 %v1547_v33, %v496_v23  ;;  %v521_v47 = vsel %vm1591_vm8, %v1540_v13, %v517_v14  ;;  %892 = vrsqrt.f32 %v1598_v58  ;;  %v1626_v3 = vadd.f32 1e-05, %v324_v20  ;;  %vm480_vm13 = vmor %vm478_vm11, %vm479_vm9 }
 0x139   :  { %v477_v61 = vmul.f32 %v1559_v42, %v476_v40  ;;  %v1628_v26 = vpop.eup %888  ;;  %v706_v30 = vmul.f32 %v521_v47, %v1208_v51  ;;  %v547_v16 = vmul.f32 %v887_v44, %v546_v43  ;;  %894 = vrsqrt.f32 %v1612_v17 }
 0x13a   :  { %v501_v13 = vsel %vm1607_vm10, %v1547_v33, %v497_v54  ;;  %v523_v25 = vmul.f32 %v1628_v26, %v1556_v22  ;;  %vm528_vm14 = vweird.f32 %v1556_v22  ;;  %vm508_vm15 = vweird.f32 %v1578_v11 }
 0x13b   :  { %v704_v46 = vmul.f32 %v501_v13, %v1211_v52  ;;  %v481_v20 = vsel %vm480_vm13, %v1559_v42, %v477_v61  ;;  %v1641_v39 = vpop.eup %890  ;;  %v742_v51 = vmul.f32 %v1357_v59, %v706_v30  ;;  %v551_v33 = vsel %vm1621_vm12, %v887_v44, %v547_v16  ;;  %v1673_v40 = vpop.xlane.xlu0 %288 }
 0x13c   :  { %v702_v19 = vmul.f32 %v481_v20, %v1203_v9  ;;  %v709_v52 = vmul.f32 %v551_v33, %v1226_v1  ;;  %v524_v42 = vmul.f32 %v1628_v26, %v523_v25  ;;  %v503_v41 = vmul.f32 %v1641_v39, %v1578_v11 }
 0x13d   :  { %v740_v53 = vmul.f32 %v1357_v59, %v704_v46  ;;  %v778_v5 = vadd.f32 %v1374_v56, %v742_v51  ;;  %vm578_vm0 = vweird.f32 %v1598_v58  ;;  %896 = vrsqrt.f32 %v1626_v3 }
 0x13e   :  { %v738_v9 = vmul.f32 %v1357_v59, %v702_v19  ;;  %v1658_v44 = vpop.eup %892  ;;  %v745_v1 = vmul.f32 %v1357_v59, %v709_v52  ;;  %v525_v0 = vmul.f32 0.5, %v524_v42  ;;  %v504_v6 = vmul.f32 %v1641_v39, %v503_v41  ;;  %v293_v47 = vpop.xlane.xlu2 %292 }
 0x13f   :  { %v776_v31 = vadd.f32 %v1374_v56, %v740_v53  ;;  %v1663_v4 = vpop.eup %894  ;;  %810 = vst [vmem:[#allocation7 + $0x70] sm:$0xff] %v778_v5  ;;  %vm529_vm1 = vweird.f32 %v1628_v26  ;;  %v573_v32 = vmul.f32 %v1658_v44, %v1598_v58  ;;  %vm558_vm2 = vweird.f32 %v1612_v17  ;;  %v297_v13 = vpop.xlane.xlu1 %296 }
 0x140   :  { %v774_v45 = vadd.f32 %v1374_v56, %v738_v9  ;;  %v781_v63 = vadd.f32 %v1374_v56, %v745_v1  ;;  %v526_v23 = vsub.f32 1.5, %v525_v0  ;;  %v505_v50 = vmul.f32 0.5, %v504_v6  ;;  %vm530_vm5 = vmor %vm528_vm14, %vm529_vm1 }
 0x141   :  { %808 = vst [vmem:[#allocation7 + $0x60] sm:$0xff] %v776_v31  ;;  %v553_v14 = vmul.f32 %v1663_v4, %v1612_v17  ;;  %vm509_vm3 = vweird.f32 %v1641_v39  ;;  %v574_v54 = vmul.f32 %v1658_v44, %v573_v32  ;;  %v331_v29 = vmul.f32 %v291_v55, %v1133_v38 }
 0x142   :  { %806 = vst [vmem:[#allocation7 + $0x50] sm:$0xff] %v774_v45  ;;  %v329_v43 = vmul.f32 %v287_v10, %v1133_v38  ;;  %v527_v61 = vmul.f32 %v1628_v26, %v526_v23  ;;  %v506_v57 = vsub.f32 1.5, %v505_v50  ;;  %vm579_vm4 = vweird.f32 %v1658_v44  ;;  %vm510_vm6 = vmor %vm508_vm15, %vm509_vm3 }
 0x143   :  { %813 = vst [vmem:[#allocation7 + $0x88] sm:$0xff] %v781_v63  ;;  %v554_v30 = vmul.f32 %v1663_v4, %v553_v14  ;;  %v897_v16 = vpop.eup %896  ;;  %v575_v46 = vmul.f32 0.5, %v574_v54  ;;  %v1686_v55 = vadd.f32 1e-05, %v331_v29  ;;  %v327_v20 = vmul.f32 %v1600_v8, %v1133_v38  ;;  %vm1707_vm7 = vmor %vm578_vm0, %vm579_vm4  ;;  %v1731_v63 = vpop.xlane.xlu0 %294 }
 0x144   :  { %v1688_v10 = vadd.f32 1e-05, %v329_v43  ;;  %v531_v25 = vsel %vm530_vm5, %v1628_v26, %v527_v61  ;;  %v507_v51 = vmul.f32 %v1641_v39, %v506_v57  ;;  %v533_v33 = vmul.f32 %v897_v16, %v1626_v3 }
 0x145   :  { %v555_v19 = vmul.f32 0.5, %v554_v30  ;;  %v707_v53 = vmul.f32 %v531_v25, %v1229_v2  ;;  %v576_v22 = vsub.f32 1.5, %v575_v46  ;;  %898 = vrsqrt.f32 %v1686_v55 }
 0x146   :  { %v334_v52 = vmul.f32 %v297_v13, %v1133_v38  ;;  %v511_v8 = vsel %vm510_vm6, %v1641_v39, %v507_v51  ;;  %vm559_vm8 = vweird.f32 %v1663_v4  ;;  %v534_v11 = vmul.f32 %v897_v16, %v533_v33  ;;  %v299_v17 = vpop.xlane.xlu2 %298 }
 0x147   :  { %v556_v2 = vsub.f32 1.5, %v555_v19  ;;  %v743_v42 = vmul.f32 %v1357_v59, %v707_v53  ;;  %v705_v41 = vmul.f32 %v511_v8, %v1221_v12  ;;  %v577_v5 = vmul.f32 %v1658_v44, %v576_v22  ;;  %vm560_vm10 = vmor %vm558_vm2, %vm559_vm8  ;;  %v303_v13 = vpop.xlane.xlu1 %302 }
 0x148   :  { %900 = vrsqrt.f32 %v1688_v10  ;;  %v535_v9 = vmul.f32 0.5, %v534_v11  ;;  %vm539_vm9 = vweird.f32 %v897_v16  ;;  %v1717_v58 = vadd.f32 1e-05, %v327_v20 }
 0x149   :  { %v557_v39 = vmul.f32 %v1663_v4, %v556_v2  ;;  %v779_v31 = vadd.f32 %v1374_v56, %v743_v42  ;;  %v741_v1 = vmul.f32 %v1357_v59, %v705_v41  ;;  %v581_v0 = vsel %vm1707_vm7, %v1658_v44, %v577_v5 }
 0x14a   :  { %v1726_v12 = vadd.f32 1e-05, %v334_v52  ;;  %v712_v6 = vmul.f32 %v581_v0, %v1244_v36  ;;  %v536_v32 = vsub.f32 1.5, %v535_v9  ;;  %902 = vrsqrt.f32 %v1717_v58 }
 0x14b   :  { %v561_v45 = vsel %vm560_vm10, %v1663_v4, %v557_v39  ;;  %v1733_v23 = vpop.eup %898  ;;  %811 = vst [vmem:[#allocation7 + $0x78] sm:$0xff] %v779_v31  ;;  %v777_v50 = vadd.f32 %v1374_v56, %v741_v1  ;;  %vm538_vm11 = vweird.f32 %v1626_v3  ;;  %vm608_vm13 = vweird.f32 %v1686_v55  ;;  %v1791_v39 = vpop.xlane.xlu0 %300 }
 0x14c   :  { %v710_v44 = vmul.f32 %v561_v45, %v1247_v37  ;;  %904 = vrsqrt.f32 %v1726_v12  ;;  %v748_v14 = vmul.f32 %v1357_v59, %v712_v6  ;;  %v537_v36 = vmul.f32 %v897_v16, %v536_v32  ;;  %vm540_vm12 = vmor %vm538_vm11, %vm539_vm9 }
 0x14d   :  { %v603_v4 = vmul.f32 %v1733_v23, %v1686_v55  ;;  %809 = vst [vmem:[#allocation7 + $0x68] sm:$0xff] %v777_v50  ;;  %v332_v37 = vmul.f32 %v293_v47, %v1133_v38  ;;  %v330_v43 = vmul.f32 %v1673_v40, %v1133_v38  ;;  %vm588_vm14 = vweird.f32 %v1688_v10 }
 0x14e   :  { %v1742_v54 = vpop.eup %900  ;;  %v746_v29 = vmul.f32 %v1357_v59, %v710_v44  ;;  %v784_v61 = vadd.f32 %v1374_v56, %v748_v14  ;;  %v541_v3 = vsel %vm540_vm12, %v897_v16, %v537_v36  ;;  %vm609_vm15 = vweird.f32 %v1733_v23  ;;  %v305_v1 = vpop.xlane.xlu2 %304 }
 0x14f   :  { %v604_v57 = vmul.f32 %v1733_v23, %v603_v4  ;;  %v583_v30 = vmul.f32 %v1742_v54, %v1688_v10  ;;  %v708_v20 = vmul.f32 %v541_v3, %v1239_v15  ;;  %v1757_v25 = vadd.f32 1e-05, %v332_v37  ;;  %vm1781_vm2 = vmor %vm608_vm13, %vm609_vm15 }
 0x150   :  { %v782_v46 = vadd.f32 %v1374_v56, %v746_v29  ;;  %v1759_v47 = vpop.eup %902  ;;  %816 = vst [vmem:[#allocation7 + $0xa0] sm:$0xff] %v784_v61  ;;  %v1763_v51 = vadd.f32 1e-05, %v330_v43  ;;  %vm568_vm0 = vweird.f32 %v1717_v58  ;;  %v337_v53 = vmul.f32 %v303_v13, %v1133_v38 }
 0x151   :  { %v605_v40 = vmul.f32 0.5, %v604_v57  ;;  %v584_v16 = vmul.f32 %v1742_v54, %v583_v30  ;;  %v744_v33 = vmul.f32 %v1357_v59, %v708_v20  ;;  %v563_v15 = vmul.f32 %v1759_v47, %v1717_v58 }
 0x152   :  { %v1765_v19 = vpop.eup %904  ;;  %814 = vst [vmem:[#allocation7 + $0x90] sm:$0xff] %v782_v46  ;;  %906 = vrsqrt.f32 %v1757_v25  ;;  %vm638_vm1 = vweird.f32 %v1726_v12  ;;  %vm589_vm3 = vweird.f32 %v1742_v54  ;;  %vm569_vm4 = vweird.f32 %v1759_v47 }
 0x153   :  { %v606_v22 = vsub.f32 1.5, %v605_v40  ;;  %v585_v52 = vmul.f32 0.5, %v584_v16  ;;  %v633_v8 = vmul.f32 %v1765_v19, %v1726_v12  ;;  %v780_v26 = vadd.f32 %v1374_v56, %v744_v33  ;;  %vm590_vm7 = vmor %vm588_vm14, %vm589_vm3 }
 0x154   :  { %v564_v11 = vmul.f32 %v1759_v47, %v563_v15  ;;  %908 = vrsqrt.f32 %v1763_v51  ;;  %vm639_vm5 = vweird.f32 %v1765_v19  ;;  %v1794_v9 = vadd.f32 1e-05, %v337_v53  ;;  %vm570_vm9 = vmor %vm568_vm0, %vm569_vm4 }
 0x155   :  { %v607_v42 = vmul.f32 %v1733_v23, %v606_v22  ;;  %v586_v41 = vsub.f32 1.5, %v585_v52  ;;  %v634_v5 = vmul.f32 %v1765_v19, %v633_v8  ;;  %812 = vst [vmem:[#allocation7 + $0x80] sm:$0xff] %v780_v26  ;;  %v335_v31 = vmul.f32 %v299_v17, %v1133_v38  ;;  %vm1823_vm8 = vmor %vm638_vm1, %vm639_vm5  ;;  %v307_v22 = vpop.xlane.xlu0 %306 }
 0x156   :  { %v565_v55 = vmul.f32 0.5, %v564_v11  ;;  %vm618_vm6 = vweird.f32 %v1757_v25  ;;  %910 = vrsqrt.f32 %v1794_v9  ;;  %v338_v4 = vmul.f32 %v305_v1, %v1133_v38 }
 0x157   :  { %v611_v0 = vsel %vm1781_vm2, %v1733_v23, %v607_v42  ;;  %v587_v6 = vmul.f32 %v1742_v54, %v586_v41  ;;  %v635_v45 = vmul.f32 0.5, %v634_v5  ;;  %v333_v23 = vmul.f32 %v1731_v63, %v1133_v38 }
 0x158   :  { %v1802_v32 = vpop.eup %906  ;;  %v715_v50 = vmul.f32 %v611_v0, %v1262_v48  ;;  %v566_v44 = vsub.f32 1.5, %v565_v55  ;;  %vm598_vm10 = vweird.f32 %v1763_v51  ;;  %vm668_vm11 = vweird.f32 %v1794_v9 }
 0x159   :  { %v591_v17 = vsel %vm590_vm7, %v1742_v54, %v587_v6  ;;  %v636_v14 = vsub.f32 1.5, %v635_v45  ;;  %v613_v36 = vmul.f32 %v1802_v32, %v1757_v25  ;;  %v1827_v54 = vadd.f32 1e-05, %v335_v31 }
 0x15a   :  { %v909_v48 = vpop.eup %908  ;;  %v751_v29 = vmul.f32 %v1357_v59, %v715_v50  ;;  %v713_v10 = vmul.f32 %v591_v17, %v1265_v49  ;;  %v567_v37 = vmul.f32 %v1759_v47, %v566_v44  ;;  %vm619_vm12 = vweird.f32 %v1802_v32 }
 0x15b   :  { %v637_v43 = vmul.f32 %v1765_v19, %v636_v14  ;;  %v614_v49 = vmul.f32 %v1802_v32, %v613_v36  ;;  %v593_v61 = vmul.f32 %v909_v48, %v1763_v51  ;;  %912 = vrsqrt.f32 %v1827_v54  ;;  %vm620_vm15 = vmor %vm618_vm6, %vm619_vm12 }
 0x15c   :  { %v787_v12 = vadd.f32 %v1374_v56, %v751_v29  ;;  %v749_v3 = vmul.f32 %v1357_v59, %v713_v10  ;;  %v571_v57 = vsel %vm570_vm9, %v1759_v47, %v567_v37  ;;  %v911_v20 = vpop.eup %910  ;;  %v1849_v33 = vadd.f32 1e-05, %v333_v23 }
 0x15d   :  { %v711_v58 = vmul.f32 %v571_v57, %v1257_v18  ;;  %v641_v30 = vsel %vm1823_vm8, %v1765_v19, %v637_v43  ;;  %v615_v13 = vmul.f32 0.5, %v614_v49  ;;  %v594_v46 = vmul.f32 %v909_v48, %v593_v61 }
 0x15e   :  { %819 = vst [vmem:[#allocation7 + $0xb8] sm:$0xff] %v787_v12  ;;  %v785_v40 = vadd.f32 %v1374_v56, %v749_v3  ;;  %v718_v16 = vmul.f32 %v641_v30, %v1280_v60  ;;  %v663_v53 = vmul.f32 %v911_v20, %v1794_v9  ;;  %vm599_vm13 = vweird.f32 %v909_v48 }
 0x15f   :  { %v747_v47 = vmul.f32 %v1357_v59, %v711_v58  ;;  %v616_v15 = vsub.f32 1.5, %v615_v13  ;;  %v595_v18 = vmul.f32 0.5, %v594_v46  ;;  %vm669_vm14 = vweird.f32 %v911_v20  ;;  %vm600_vm0 = vmor %vm598_vm10, %vm599_vm13 }
 0x160   :  { %817 = vst [vmem:[#allocation7 + $0xa8] sm:$0xff] %v785_v40  ;;  %v754_v19 = vmul.f32 %v1357_v59, %v718_v16  ;;  %914 = vrsqrt.f32 %v1849_v33  ;;  %v664_v26 = vmul.f32 %v911_v20, %v663_v53  ;;  %v1862_v42 = vadd.f32 1e-05, %v338_v4  ;;  %vm1881_vm1 = vmor %vm668_vm11, %vm669_vm14 }
 0x161   :  { %v783_v60 = vadd.f32 %v1374_v56, %v747_v47  ;;  %v617_v52 = vmul.f32 %v1802_v32, %v616_v15  ;;  %v596_v8 = vsub.f32 1.5, %v595_v18  ;;  %v913_v2 = vpop.eup %912  ;;  %v336_v41 = vmul.f32 %v1791_v39, %v1133_v38 }
 0x162   :  { %v790_v11 = vadd.f32 %v1374_v56, %v754_v19  ;;  %v339_v5 = vmul.f32 %v307_v22, %v1133_v38  ;;  %v665_v1 = vmul.f32 0.5, %v664_v26  ;;  %v643_v0 = vmul.f32 %v913_v2, %v1827_v54 }
 0x163   :  { %815 = vst [vmem:[#allocation7 + $0x98] sm:$0xff] %v783_v60  ;;  %v621_v55 = vsel %vm620_vm15, %v1802_v32, %v617_v52  ;;  %v597_v31 = vmul.f32 %v909_v48, %v596_v8  ;;  %916 = vrsqrt.f32 %v1862_v42  ;;  %v1874_v38 = vadd.f32 1e-05, %v336_v41 }
 0x164   :  { %822 = vst [vmem:[#allocation7 + $0xd0] sm:$0xff] %v790_v11  ;;  %v716_v6 = vmul.f32 %v621_v55, %v1283_v62  ;;  %v666_v39 = vsub.f32 1.5, %v665_v1  ;;  %v644_v45 = vmul.f32 %v913_v2, %v643_v0  ;;  %v1885_v51 = vadd.f32 1e-05, %v339_v5 }
 0x165   :  { %v601_v25 = vsel %vm600_vm0, %v909_v48, %v597_v31  ;;  %vm648_vm2 = vweird.f32 %v1827_v54  ;;  %vm649_vm3 = vweird.f32 %v913_v2  ;;  %918 = vrsqrt.f32 %v1874_v38 }
 0x166   :  { %v915_v50 = vpop.eup %914  ;;  %v752_v32 = vmul.f32 %v1357_v59, %v716_v6  ;;  %v714_v44 = vmul.f32 %v601_v25, %v1275_v21  ;;  %v667_v23 = vmul.f32 %v911_v20, %v666_v39  ;;  %v645_v17 = vmul.f32 0.5, %v644_v45  ;;  %vm650_vm4 = vmor %vm648_vm2, %vm649_vm3  ;;  %v923_v39 = vld [vmem:[%s1930_s2] ss:$0 sm:$0xff] }
 0x167   :  { %v623_v14 = vmul.f32 %v915_v50, %v1849_v33  ;;  %920 = vrsqrt.f32 %v1885_v51  ;;  %vm629_vm5 = vweird.f32 %v915_v50  ;;  %vm628_vm6 = vweird.f32 %v1849_v33 }
 0x168   :  { %v788_v36 = vadd.f32 %v1374_v56, %v752_v32  ;;  %v750_v4 = vmul.f32 %v1357_v59, %v714_v44  ;;  %v671_v21 = vsel %vm1881_vm1, %v911_v20, %v667_v23  ;;  %v646_v9 = vsub.f32 1.5, %v645_v17  ;;  %vm630_vm7 = vmor %vm628_vm6, %vm629_vm5 }
 0x169   :  { %v624_v48 = vmul.f32 %v915_v50, %v623_v14  ;;  %v917_v29 = vpop.eup %916  ;;  %v721_v37 = vmul.f32 %v671_v21, %v1298_v34  ;;  %vm678_vm8 = vweird.f32 %v1862_v42  ;;  %vm658_vm13 = vweird.f32 %v1874_v38 }
 0x16a   :  { %820 = vst [vmem:[#allocation7 + $0xc0] sm:$0xff] %v788_v36  ;;  %v786_v10 = vadd.f32 %v1374_v56, %v750_v4  ;;  %v647_v63 = vmul.f32 %v913_v2, %v646_v9  ;;  %v673_v49 = vmul.f32 %v917_v29, %v1862_v42  ;;  %vm679_vm9 = vweird.f32 %v917_v29 }
 0x16b   :  { %v625_v43 = vmul.f32 0.5, %v624_v48  ;;  %v757_v61 = vmul.f32 %v1357_v59, %v721_v37  ;;  %v919_v58 = vpop.eup %918  ;;  %vm680_vm10 = vmor %vm678_vm8, %vm679_vm9  ;;  %vm688_vm15 = vweird.f32 %v1885_v51 }
 0x16c   :  { %818 = vst [vmem:[#allocation7 + $0xb0] sm:$0xff] %v786_v10  ;;  %v651_v12 = vsel %vm650_vm4, %v913_v2, %v647_v63  ;;  %v674_v57 = vmul.f32 %v917_v29, %v673_v49  ;;  %v653_v40 = vmul.f32 %v919_v58, %v1874_v38  ;;  %vm659_vm11 = vweird.f32 %v919_v58 }
 0x16d   :  { %v626_v3 = vsub.f32 1.5, %v625_v43  ;;  %v793_v30 = vadd.f32 %v1374_v56, %v757_v61  ;;  %v719_v34 = vmul.f32 %v651_v12, %v1301_v35  ;;  %v921_v13 = vpop.eup %920  ;;  %vm660_vm14 = vmor %vm658_vm13, %vm659_vm11 }
 0x16e   :  { %v675_v20 = vmul.f32 0.5, %v674_v57  ;;  %v683_v16 = vmul.f32 %v921_v13, %v1885_v51  ;;  %v654_v18 = vmul.f32 %v919_v58, %v653_v40  ;;  %vm689_vm12 = vweird.f32 %v921_v13 }
 0x16f   :  { %v627_v46 = vmul.f32 %v915_v50, %v626_v3  ;;  %825 = vst [vmem:[#allocation7 + $0xe8] sm:$0xff] %v793_v30  ;;  %v755_v54 = vmul.f32 %v1357_v59, %v719_v34  ;;  %vm690_vm0 = vmor %vm688_vm15, %vm689_vm12 }
 0x170   :  { %v676_v15 = vsub.f32 1.5, %v675_v20  ;;  %v684_v33 = vmul.f32 %v921_v13, %v683_v16  ;;  %v655_v19 = vmul.f32 0.5, %v654_v18 }
 0x171   :  { %v631_v47 = vsel %vm630_vm7, %v915_v50, %v627_v46  ;;  %v791_v35 = vadd.f32 %v1374_v56, %v755_v54 }
 0x172   :  { %v717_v53 = vmul.f32 %v631_v47, %v1293_v24  ;;  %v677_v22 = vmul.f32 %v917_v29, %v676_v15  ;;  %v685_v52 = vmul.f32 0.5, %v684_v33  ;;  %v656_v26 = vsub.f32 1.5, %v655_v19  ;;  %v922_v24 = vld [vmem:[#allocation5] ss:$0 sm:$0xff] }
 0x173   :  { %823 = vst [vmem:[#allocation7 + $0xd8] sm:$0xff] %v791_v35 }
 0x174   :  { %v753_v60 = vmul.f32 %v1357_v59, %v717_v53  ;;  %v681_v8 = vsel %vm680_vm10, %v917_v29, %v677_v22  ;;  %v686_v42 = vsub.f32 1.5, %v685_v52  ;;  %v657_v41 = vmul.f32 %v919_v58, %v656_v26 }
 0x175   :  { %v722_v11 = vmul.f32 %v681_v8, %v1315_v7 }
 0x176   :  { %v789_v2 = vadd.f32 %v1374_v56, %v753_v60  ;;  %v687_v55 = vmul.f32 %v921_v13, %v686_v42  ;;  %v661_v59 = vsel %vm660_vm14, %v919_v58, %v657_v41 }
 0x177   :  { %v758_v5 = vmul.f32 %v922_v24, %v722_v11  ;;  %v720_v1 = vmul.f32 %v661_v59, %v1311_v27 }
 0x178   :  { %821 = vst [vmem:[#allocation7 + $0xc8] sm:$0xff] %v789_v2  ;;  %v691_v0 = vsel %vm690_vm0, %v921_v13, %v687_v55 }
 0x179   :  { %v794_v31 = vadd.f32 %v1374_v56, %v758_v5  ;;  %v723_v7 = vmul.f32 %v691_v0, %v1323_v28  ;;  %v756_v6 = vmul.f32 %v922_v24, %v720_v1 }
 0x17b   :  { %826 = vst [vmem:[#allocation7 + $0xf0] sm:$0xff] %v794_v31  ;;  %v759_v25 = vmul.f32 %v922_v24, %v723_v7  ;;  %v792_v45 = vadd.f32 %v923_v39, %v756_v6 }
 0x17d   :  { %v795_v56 = vadd.f32 %v923_v39, %v759_v25  ;;  %824 = vst [vmem:[#allocation7 + $0xe0] sm:$0xff] %v792_v45 }
 0x17f   :  { %827 = vst [vmem:[#allocation7 + $0xf8] sm:$0xff] %v795_v56 }
 0x180   :  { %840 = dma.vmem_to_hbm [thread:$0]  %s833_s25, 4096, %s835_s28, [#allocation4], %s1003_s20, %s1003_s20, %s1004_s21  }
 0x181   :  { %1000 = dma.done.wait [#allocation4], 4096  }
 0x182   :  { %1001 = vsyncadd [#allocation4], 4294963200 }
 0x183   :  { %845 = vsyncpa [#allocation3], 1 }
 0x184   :  { %846 = vsyncpa [#allocation6], 1 }
 0x185   :  { %847 = vsyncpa [#allocation4], 1 }

</bundles_post_ra>
